<compile_context>
chip_gen: v7x
topology: tpu7x:2x2x1
jax: 0.10.0
libtpu: 0.0.40
codegen_flags: <defaults>
</compile_context>

<pallas_src>
import functools

import jax
import jax.numpy as jnp
from jax import lax
from jax.experimental import pallas as pl
from jax.experimental.pallas import tpu as pltpu

EPS = 1e-6

CFG = dict(
    vocab_size=256,
    emb_dim=64,
    n_heads=4,
    head_dim=16,
    n_kv_groups=2,
    hidden_dim=128,
    n_layers=2,
    context_length=16,
    rope_base=10000.0,
    qk_norm=True,
    dtype=jnp.float32,
)


# ------------------------------ fused kernel --------------------------------

def _qwen3_fused_kernel(x_ref, n1_ref, wqkv_ref, qksc_ref, wo_ref,
                        n2_ref, w12_ref, w3_ref, fn_ref, wout_ref,
                        cos_ref, sin_ref, m_ref, r_ref, o_ref,
                        *, n_layers, n_heads, n_kv, head_dim, hidden):
    S = x_ref.shape[0]
    g = n_heads // n_kv
    q_w = n_heads * head_dim
    k_w = n_kv * head_dim
    qk_w = q_w + k_w
    qkv_w = qk_w + k_w

    # Loop-invariant constants: hoisted (loaded / built once for the whole forward).
    cosP = cos_ref[...]                               # (S, qkv_w), scale folded in q cols
    sinP = sin_ref[...]
    M = m_ref[...]                                    # (qkv_w, qkv_w) block-diag mean
    R = r_ref[...]                                    # (qkv_w, qkv_w) block-diag rot-half
    row = lax.broadcasted_iota(jnp.int32, (S, S), 0)
    col = lax.broadcasted_iota(jnp.int32, (S, S), 1)
    causal = col <= row
    qk_mask = lax.broadcasted_iota(jnp.int32, (1, qkv_w), 1) < qk_w

    x = x_ref[...].astype(jnp.float32)                # (S, D) resident for all stages

    for l in range(n_layers):
        # ---- RMSNorm(norm1) + fused QKV + per-head qk RMSNorm + RoPE (128-lane dense)
        var = jnp.mean(x * x, axis=-1, keepdims=True)
        h = x * lax.rsqrt(var + EPS) * n1_ref[l]
        qkv = lax.dot_general(h, wqkv_ref[l], (((1,), (1,)), ((), ())),
                              preferred_element_type=jnp.float32)      # (S, qkv_w)
        var_h = lax.dot_general(qkv * qkv, M, (((1,), (0,)), ((), ())),
                                preferred_element_type=jnp.float32)
        inv = jnp.where(qk_mask, lax.rsqrt(var_h + EPS), 1.0)          # V cols untouched
        qkv = qkv * inv * qksc_ref[l]                                  # ones on V cols
        rot = lax.dot_general(qkv, R, (((1,), (0,)), ((), ())),
                              preferred_element_type=jnp.float32)      # zero on V cols
        qkv = qkv * cosP + rot * sinP                                  # cos=1/sin=0 on V

        # ---- causal GQA attention (per head, KV shared by static lane slicing)
        ctx = []
        for hh in range(n_heads):
            kvg = hh // g
            qh = qkv[:, hh * head_dim:(hh + 1) * head_dim]
            kh = qkv[:, q_w + kvg * head_dim:q_w + (kvg + 1) * head_dim]
            vh = qkv[:, qk_w + kvg * head_dim:qk_w + (kvg + 1) * head_dim]
            s = lax.dot_general(qh, kh, (((1,), (1,)), ((), ())),
                                preferred_element_type=jnp.float32)    # (S, S)
            s = jnp.where(causal, s, -jnp.inf)                         # scale already in q
            mx = jnp.max(s, axis=-1, keepdims=True)
            e = jnp.exp(s - mx)
            w = e * pl.reciprocal(jnp.sum(e, axis=-1, keepdims=True), approx=True)
            ctx.append(jnp.dot(w, vh, preferred_element_type=jnp.float32))
        ctx_all = jnp.concatenate(ctx, axis=-1)                        # (S, H*hd)
        # single K=H*hd output projection + fused residual add
        x = x + lax.dot_general(ctx_all, wo_ref[l], (((1,), (1,)), ((), ())),
                                preferred_element_type=jnp.float32)

        # ---- RMSNorm(norm2) + SwiGLU FFN + residual (all in VMEM)
        var = jnp.mean(x * x, axis=-1, keepdims=True)
        h = x * lax.rsqrt(var + EPS) * n2_ref[l]
        h12 = lax.dot_general(h, w12_ref[l], (((1,), (1,)), ((), ())),
                              preferred_element_type=jnp.float32)      # (S, 2*hidden)
        h1 = h12[:, :hidden]
        h2 = h12[:, hidden:]
        ff = (h1 * jax.nn.sigmoid(h1)) * h2
        x = x + lax.dot_general(ff, w3_ref[l], (((1,), (1,)), ((), ())),
                                preferred_element_type=jnp.float32)

    # ---- final RMSNorm + LM head (lane-dense 256-wide output)
    var = jnp.mean(x * x, axis=-1, keepdims=True)
    h = x * lax.rsqrt(var + EPS) * fn_ref[...]
    o_ref[...] = lax.dot_general(h, wout_ref[...], (((1,), (1,)), ((), ())),
                                 preferred_element_type=jnp.float32).astype(o_ref.dtype)


# ------------------------------- model glue ---------------------------------

def compute_rope_params(head_dim, theta_base, context_length):
    inv_freq = 1.0 / theta_base ** (
        jnp.arange(0, head_dim, 2, dtype=jnp.float32) / head_dim)
    positions = jnp.arange(context_length, dtype=jnp.float32)
    angles = positions[:, None] * inv_freq[None, :]
    angles = jnp.concatenate([angles, angles], axis=1)
    return jnp.cos(angles), jnp.sin(angles)


def build_rope_constants(cfg, S):
    """Lane-dense (128-wide) constant tables shared by all layers."""
    hd, H, KV = cfg["head_dim"], cfg["n_heads"], cfg["n_kv_groups"]
    nh_qk = H + KV
    q_w, qk_w, v_w = H * hd, nh_qk * hd, KV * hd
    qkv_w = qk_w + v_w
    cos, sin = compute_rope_params(hd, cfg["rope_base"], cfg["context_length"])
    cos, sin = cos[:S], sin[:S]
    scale = 1.0 / (hd ** 0.5)
    colscale = jnp.concatenate(
        [jnp.full((1, q_w), scale, jnp.float32),
         jnp.ones((1, qk_w - q_w), jnp.float32)], axis=1)
    cos_qk = jnp.tile(cos, (1, nh_qk)) * colscale
    sin_qk = jnp.tile(sin, (1, nh_qk)) * colscale
    cosP = jnp.concatenate([cos_qk, jnp.ones((S, v_w), jnp.float32)], axis=1)
    sinP = jnp.concatenate([sin_qk, jnp.zeros((S, v_w), jnp.float32)], axis=1)
    half = hd // 2
    idx = jnp.arange(half)
    blk = jnp.zeros((hd, hd), jnp.float32)
    blk = blk.at[half + idx, idx].set(-1.0)
    blk = blk.at[idx, half + idx].set(1.0)
    R = jnp.zeros((qkv_w, qkv_w), jnp.float32)
    R = R.at[:qk_w, :qk_w].set(jnp.kron(jnp.eye(nh_qk, dtype=jnp.float32), blk))
    M = jnp.zeros((qkv_w, qkv_w), jnp.float32)
    M = M.at[:qk_w, :qk_w].set(
        jnp.kron(jnp.eye(nh_qk, dtype=jnp.float32),
                 jnp.full((hd, hd), 1.0 / hd, jnp.float32)))
    return cosP, sinP, M, R


def prepare_fused_params(params, cfg):
    """One-time weight repack: fuse QKV / fc1-fc2 and stack layers on a leading axis."""
    H, KV, hd, D = cfg["n_heads"], cfg["n_kv_groups"], cfg["head_dim"], cfg["emb_dim"]
    v_w = KV * hd
    layers = params["layers"]
    qk_scales = [
        jnp.concatenate([jnp.tile(lp["q_norm"], H), jnp.tile(lp["k_norm"], KV),
                         jnp.ones((v_w,), jnp.float32)]).reshape(1, (H + KV) * hd + v_w)
        for lp in layers]
    return dict(
        tok_emb=params["tok_emb"],
        out_head=params["out_head"],                          # (V, D) nn.Linear layout
        final_norm=params["final_norm"].reshape(1, D),
        norm1=jnp.stack([lp["norm1"].reshape(1, D) for lp in layers]),
        norm2=jnp.stack([lp["norm2"].reshape(1, D) for lp in layers]),
        Wqkv=jnp.stack([jnp.concatenate([lp["Wq"], lp["Wk"], lp["Wv"]], axis=0)
                        for lp in layers]),                   # (L, 128, D)
        qk_scale=jnp.stack(qk_scales),                        # (L, 1, 128)
        Wo=jnp.stack([lp["Wo"] for lp in layers]),            # (L, D, H*hd)
        W12=jnp.stack([jnp.concatenate([lp["fc1"], lp["fc2"]], axis=0)
                       for lp in layers]),                    # (L, 2*hid, D)
        W3=jnp.stack([lp["fc3"] for lp in layers]),           # (L, D, hid)
    )


def qwen3_forward(fused, in_idx, cfg):
    B, S = in_idx.shape
    D, V = cfg["emb_dim"], cfg["vocab_size"]
    H, KV, hd, hid, L = (cfg["n_heads"], cfg["n_kv_groups"], cfg["head_dim"],
                         cfg["hidden_dim"], cfg["n_layers"])
    qkv_w = (H + 2 * KV) * hd

    # TODO(synk): embedding gather stays as jnp.take outside the kernel (no clean
    # dense Pallas tile for a tiny row gather).
    x = jnp.take(fused["tok_emb"], in_idx, axis=0).reshape(B * S, D)
    cosP, sinP, M, R = build_rope_constants(cfg, S)

    kernel = functools.partial(
        _qwen3_fused_kernel, n_layers=L, n_heads=H, n_kv=KV,
        head_dim=hd, hidden=hid)

    logits = pl.pallas_call(
        kernel,
        out_shape=jax.ShapeDtypeStruct((B * S, V), x.dtype),
        grid=(B,),
        in_specs=[
            pl.BlockSpec((S, D), lambda b: (b, 0)),                 # x (per batch)
            pl.BlockSpec((L, 1, D), lambda b: (0, 0, 0)),           # norm1
            pl.BlockSpec((L, qkv_w, D), lambda b: (0, 0, 0)),       # Wqkv
            pl.BlockSpec((L, 1, qkv_w), lambda b: (0, 0, 0)),       # qk scales (padded)
            pl.BlockSpec((L, D, H * hd), lambda b: (0, 0, 0)),      # Wo
            pl.BlockSpec((L, 1, D), lambda b: (0, 0, 0)),           # norm2
            pl.BlockSpec((L, 2 * hid, D), lambda b: (0, 0, 0)),     # W12
            pl.BlockSpec((L, D, hid), lambda b: (0, 0, 0)),         # W3
            pl.BlockSpec((1, D), lambda b: (0, 0)),                 # final norm
            pl.BlockSpec((V, D), lambda b: (0, 0)),                 # out head
            pl.BlockSpec((S, qkv_w), lambda b: (0, 0)),             # cos (padded)
            pl.BlockSpec((S, qkv_w), lambda b: (0, 0)),             # sin (padded)
            pl.BlockSpec((qkv_w, qkv_w), lambda b: (0, 0)),         # M
            pl.BlockSpec((qkv_w, qkv_w), lambda b: (0, 0)),         # R
        ],
        out_specs=pl.BlockSpec((S, V), lambda b: (b, 0)),
        compiler_params=pltpu.CompilerParams(
            dimension_semantics=("parallel",)),                     # 2 TCs on v7x
    )(x, fused["norm1"], fused["Wqkv"], fused["qk_scale"], fused["Wo"],
      fused["norm2"], fused["W12"], fused["W3"],
      fused["final_norm"], fused["out_head"], cosP, sinP, M, R)
    return logits.reshape(B, S, V)


# --------------------------- parameter init (deterministic) -----------------

def init_params(key, cfg):
    D, H, KV = cfg["emb_dim"], cfg["n_heads"], cfg["n_kv_groups"]
    hd, hid, V = cfg["head_dim"], cfg["hidden_dim"], cfg["vocab_size"]

    def nrm(k, shape):
        return (0.02 * jax.random.normal(k, shape)).astype(jnp.float32)

    keys = jax.random.split(key, 2 + cfg["n_layers"])
    params = {
        "tok_emb": nrm(keys[0], (V, D)),
        "out_head": nrm(keys[1], (V, D)),
        "final_norm": jnp.ones((D,), jnp.float32),
        "layers": [],
    }
    for li in range(cfg["n_layers"]):
        lk = jax.random.split(keys[2 + li], 7)
        params["layers"].append(dict(
            norm1=jnp.ones((D,), jnp.float32),
            norm2=jnp.ones((D,), jnp.float32),
            q_norm=jnp.ones((hd,), jnp.float32),
            k_norm=jnp.ones((hd,), jnp.float32),
            Wq=nrm(lk[0], (H * hd, D)),
            Wk=nrm(lk[1], (KV * hd, D)),
            Wv=nrm(lk[2], (KV * hd, D)),
            Wo=nrm(lk[3], (D, H * hd)),
            fc1=nrm(lk[4], (hid, D)),
            fc2=nrm(lk[5], (hid, D)),
            fc3=nrm(lk[6], (D, hid)),
        ))
    return params


# ------------------------------ pure-JAX reference --------------------------

def _ref_rmsnorm(x, scale):
    xf = x.astype(jnp.float32)
    var = jnp.mean(xf * xf, axis=-1, keepdims=True)
    return (xf * lax.rsqrt(var + EPS) * scale).astype(x.dtype)


def _ref_rope(x, cos, sin):
    half = x.shape[-1] // 2
    x1, x2 = x[..., :half], x[..., half:]
    rotated = jnp.concatenate([-x2, x1], axis=-1)
    return (x * cos[None, None] + rotated * sin[None, None]).astype(x.dtype)


def reference_forward(params, in_idx, cfg):
    B, S = in_idx.shape
    H, KV, hd = cfg["n_heads"], cfg["n_kv_groups"], cfg["head_dim"]
    g = H // KV
    x = jnp.take(params["tok_emb"], in_idx, axis=0)
    cos, sin = compute_rope_params(hd, cfg["rope_base"], cfg["context_length"])
    cos, sin = cos[:S], sin[:S]
    mask = jnp.triu(jnp.ones((S, S), bool), k=1)
    for lp in params["layers"]:
        sc = x
        h = _ref_rmsnorm(x, lp["norm1"])
        q = (h @ lp["Wq"].T).reshape(B, S, H, hd).transpose(0, 2, 1, 3)
        k = (h @ lp["Wk"].T).reshape(B, S, KV, hd).transpose(0, 2, 1, 3)
        v = (h @ lp["Wv"].T).reshape(B, S, KV, hd).transpose(0, 2, 1, 3)
        if cfg["qk_norm"]:
            q = _ref_rmsnorm(q, lp["q_norm"])
            k = _ref_rmsnorm(k, lp["k_norm"])
        q = _ref_rope(q, cos, sin)
        k = _ref_rope(k, cos, sin)
        k = jnp.repeat(k, g, axis=1)
        v = jnp.repeat(v, g, axis=1)
        sco = jnp.einsum("bhqd,bhkd->bhqk", q, k)
        sco = jnp.where(mask, -jnp.inf, sco) / (hd ** 0.5)
        w = jax.nn.softmax(sco, axis=-1)
        ctx = jnp.einsum("bhqk,bhkd->bhqd", w, v).transpose(0, 2, 1, 3).reshape(B, S, H * hd)
        x = ctx @ lp["Wo"].T + sc
        sc = x
        h = _ref_rmsnorm(x, lp["norm2"])
        ff = (jax.nn.silu(h @ lp["fc1"].T) * (h @ lp["fc2"].T)) @ lp["fc3"].T
        x = ff + sc
    x = _ref_rmsnorm(x, params["final_norm"])
    return x @ params["out_head"].T


# ----------------------------------- main ------------------------------------

if __name__ == "__main__":
    root = jax.random.PRNGKey(0)
    k_params, k_idx = jax.random.split(root)
    params = init_params(k_params, CFG)
    fused = prepare_fused_params(params, CFG)          # one-time weight repack

    B, S = 2, 8
    in_idx = jax.random.randint(k_idx, (B, S), 0, CFG["vocab_size"], dtype=jnp.int32)

    fwd = jax.jit(lambda f, idx: qwen3_forward(f, idx, CFG))
    logits = fwd(fused, in_idx)
    jax.block_until_ready(logits)

    assert logits.shape == (B, S, CFG["vocab_size"])
    assert bool(jnp.all(jnp.isfinite(logits)))

    ref = reference_forward(params, in_idx, CFG)
    max_diff = float(jnp.max(jnp.abs(logits - ref)))
    assert max_diff < 5e-2, f"Pallas vs reference mismatch: {max_diff}"

    print("KERNEL_OK")
</pallas_src>

<mosaic_0001>
module attributes {stable_mosaic.version = 11 : i64} {
  func.func @_qwen3_fused_kernel(%arg0: i32, %arg1: memref<8x64xf32, #tpu.memory_space<vmem>>, %arg2: memref<2x1x64xf32, #tpu.memory_space<vmem>>, %arg3: memref<2x128x64xf32, #tpu.memory_space<vmem>>, %arg4: memref<2x1x128xf32, #tpu.memory_space<vmem>>, %arg5: memref<2x64x64xf32, #tpu.memory_space<vmem>>, %arg6: memref<2x1x64xf32, #tpu.memory_space<vmem>>, %arg7: memref<2x256x64xf32, #tpu.memory_space<vmem>>, %arg8: memref<2x64x128xf32, #tpu.memory_space<vmem>>, %arg9: memref<1x64xf32, #tpu.memory_space<vmem>>, %arg10: memref<256x64xf32, #tpu.memory_space<vmem>>, %arg11: memref<8x128xf32, #tpu.memory_space<vmem>>, %arg12: memref<8x128xf32, #tpu.memory_space<vmem>>, %arg13: memref<128x128xf32, #tpu.memory_space<vmem>>, %arg14: memref<128x128xf32, #tpu.memory_space<vmem>>, %arg15: memref<8x256xf32, #tpu.memory_space<vmem>>) attributes {dimension_semantics = [#tpu.dimension_semantics<parallel>], iteration_bounds = array<i64: 2>, scalar_prefetch = 0 : i64, scratch_operands = 0 : i64, tpu.core_type = #tpu.core_type<tc>, window_params = [{transform_indices = @transform_0, window_bounds = array<i64: 8, 64>}, {pipeline_mode = #tpu.pipeline_mode<synchronous>, transform_indices = @transform_1, window_bounds = array<i64: 2, 1, 64>}, {pipeline_mode = #tpu.pipeline_mode<synchronous>, transform_indices = @transform_2, window_bounds = array<i64: 2, 128, 64>}, {pipeline_mode = #tpu.pipeline_mode<synchronous>, transform_indices = @transform_3, window_bounds = array<i64: 2, 1, 128>}, {pipeline_mode = #tpu.pipeline_mode<synchronous>, transform_indices = @transform_4, window_bounds = array<i64: 2, 64, 64>}, {pipeline_mode = #tpu.pipeline_mode<synchronous>, transform_indices = @transform_5, window_bounds = array<i64: 2, 1, 64>}, {pipeline_mode = #tpu.pipeline_mode<synchronous>, transform_indices = @transform_6, window_bounds = array<i64: 2, 256, 64>}, {pipeline_mode = #tpu.pipeline_mode<synchronous>, transform_indices = @transform_7, window_bounds = array<i64: 2, 64, 128>}, {pipeline_mode = #tpu.pipeline_mode<synchronous>, transform_indices = @transform_8, window_bounds = array<i64: 1, 64>}, {pipeline_mode = #tpu.pipeline_mode<synchronous>, transform_indices = @transform_9, window_bounds = array<i64: 256, 64>}, {pipeline_mode = #tpu.pipeline_mode<synchronous>, transform_indices = @transform_10, window_bounds = array<i64: 8, 128>}, {pipeline_mode = #tpu.pipeline_mode<synchronous>, transform_indices = @transform_11, window_bounds = array<i64: 8, 128>}, {pipeline_mode = #tpu.pipeline_mode<synchronous>, transform_indices = @transform_12, window_bounds = array<i64: 128, 128>}, {pipeline_mode = #tpu.pipeline_mode<synchronous>, transform_indices = @transform_13, window_bounds = array<i64: 128, 128>}, {transform_indices = @transform_14, window_bounds = array<i64: 8, 256>}]} {
    %c0 = arith.constant 0 : index
    %c0_0 = arith.constant 0 : index
    %0 = vector.load %arg11[%c0, %c0_0] : memref<8x128xf32, #tpu.memory_space<vmem>>, vector<8x128xf32>
    %c0_1 = arith.constant 0 : index
    %c0_2 = arith.constant 0 : index
    %1 = vector.load %arg12[%c0_1, %c0_2] : memref<8x128xf32, #tpu.memory_space<vmem>>, vector<8x128xf32>
    %c0_3 = arith.constant 0 : index
    %c0_4 = arith.constant 0 : index
    %2 = vector.load %arg13[%c0_3, %c0_4] : memref<128x128xf32, #tpu.memory_space<vmem>>, vector<128x128xf32>
    %c0_5 = arith.constant 0 : index
    %c0_6 = arith.constant 0 : index
    %3 = vector.load %arg14[%c0_5, %c0_6] : memref<128x128xf32, #tpu.memory_space<vmem>>, vector<128x128xf32>
    %4 = tpu.iota {dimensions = array<i32: 0>} : vector<8x8xi32>
    %5 = tpu.iota {dimensions = array<i32: 1>} : vector<8x8xi32>
    %6 = arith.cmpi sle, %5, %4 : vector<8x8xi32>
    %7 = tpu.iota {dimensions = array<i32: 1>} : vector<1x128xi32>
    %c96_i32 = arith.constant 96 : i32
    %8 = vector.broadcast %c96_i32 : i32 to vector<1x128xi32>
    %9 = arith.cmpi slt, %7, %8 : vector<1x128xi32>
    %c0_7 = arith.constant 0 : index
    %c0_8 = arith.constant 0 : index
    %10 = vector.load %arg1[%c0_7, %c0_8] : memref<8x64xf32, #tpu.memory_space<vmem>>, vector<8x64xf32>
    %11 = arith.mulf %10, %10 : vector<8x64xf32>
    %cst = arith.constant dense<0.000000e+00> : vector<8xf32>
    %12 = vector.multi_reduction <add>, %11, %cst [1] : vector<8x64xf32> to vector<8xf32>
    %13 = vector.shape_cast %12 : vector<8xf32> to vector<8x1xf32>
    %cst_9 = arith.constant 6.400000e+01 : f32
    %14 = vector.broadcast %cst_9 : f32 to vector<8x1xf32>
    %15 = arith.divf %13, %14 : vector<8x1xf32>
    %cst_10 = arith.constant 9.99999997E-7 : f32
    %16 = vector.broadcast %cst_10 : f32 to vector<8x1xf32>
    %17 = arith.addf %15, %16 : vector<8x1xf32>
    %18 = math.rsqrt %17 : vector<8x1xf32>
    %19 = vector.broadcast %18 : vector<8x1xf32> to vector<8x64xf32>
    %20 = arith.mulf %10, %19 : vector<8x64xf32>
    %c0_11 = arith.constant 0 : index
    %c0_12 = arith.constant 0 : index
    %c0_13 = arith.constant 0 : index
    %21 = vector.load %arg2[%c0_11, %c0_12, %c0_13] : memref<2x1x64xf32, #tpu.memory_space<vmem>>, vector<1x1x64xf32>
    %22 = vector.shape_cast %21 : vector<1x1x64xf32> to vector<1x64xf32>
    %23 = vector.broadcast %22 : vector<1x64xf32> to vector<8x64xf32>
    %24 = arith.mulf %20, %23 : vector<8x64xf32>
    %c0_14 = arith.constant 0 : index
    %c0_15 = arith.constant 0 : index
    %c0_16 = arith.constant 0 : index
    %25 = vector.load %arg3[%c0_14, %c0_15, %c0_16] : memref<2x128x64xf32, #tpu.memory_space<vmem>>, vector<1x128x64xf32>
    %26 = vector.shape_cast %25 : vector<1x128x64xf32> to vector<128x64xf32>
    %cst_17 = arith.constant dense<0.000000e+00> : vector<8x128xf32>
    %27 = tpu.matmul %24, %26, %cst_17 {dimension_numbers = #tpu.dot_dimension_numbers<[1], [1], [0], [0], [0, 0, 1, 0], [], []>} : vector<8x64xf32>, vector<128x64xf32>, vector<8x128xf32> -> vector<8x128xf32>
    %28 = arith.mulf %27, %27 : vector<8x128xf32>
    %cst_18 = arith.constant dense<0.000000e+00> : vector<8x128xf32>
    %29 = tpu.matmul %28, %2, %cst_18 {dimension_numbers = #tpu.dot_dimension_numbers<[1], [0], [0], [1], [0, 0, 1, 1], [], []>} : vector<8x128xf32>, vector<128x128xf32>, vector<8x128xf32> -> vector<8x128xf32>
    %cst_19 = arith.constant 9.99999997E-7 : f32
    %30 = vector.broadcast %cst_19 : f32 to vector<8x128xf32>
    %31 = arith.addf %29, %30 : vector<8x128xf32>
    %32 = math.rsqrt %31 : vector<8x128xf32>
    %cst_20 = arith.constant 1.000000e+00 : f32
    %33 = vector.shape_cast %9 : vector<1x128xi1> to vector<1x128xi1>
    %34 = vector.broadcast %33 : vector<1x128xi1> to vector<8x128xi1>
    %35 = vector.broadcast %cst_20 : f32 to vector<8x128xf32>
    %36 = arith.select %34, %32, %35 : vector<8x128xi1>, vector<8x128xf32>
    %37 = arith.mulf %27, %36 : vector<8x128xf32>
    %c0_21 = arith.constant 0 : index
    %c0_22 = arith.constant 0 : index
    %c0_23 = arith.constant 0 : index
    %38 = vector.load %arg4[%c0_21, %c0_22, %c0_23] : memref<2x1x128xf32, #tpu.memory_space<vmem>>, vector<1x1x128xf32>
    %39 = vector.shape_cast %38 : vector<1x1x128xf32> to vector<1x128xf32>
    %40 = vector.broadcast %39 : vector<1x128xf32> to vector<8x128xf32>
    %41 = arith.mulf %37, %40 : vector<8x128xf32>
    %cst_24 = arith.constant dense<0.000000e+00> : vector<8x128xf32>
    %42 = tpu.matmul %41, %3, %cst_24 {dimension_numbers = #tpu.dot_dimension_numbers<[1], [0], [0], [1], [0, 0, 1, 1], [], []>} : vector<8x128xf32>, vector<128x128xf32>, vector<8x128xf32> -> vector<8x128xf32>
    %43 = arith.mulf %41, %0 : vector<8x128xf32>
    %44 = arith.mulf %42, %1 : vector<8x128xf32>
    %45 = arith.addf %43, %44 : vector<8x128xf32>
    %46 = vector.extract_strided_slice %45 {offsets = [0, 0], sizes = [8, 16], strides = [1, 1]} : vector<8x128xf32> to vector<8x16xf32>
    %47 = vector.extract_strided_slice %45 {offsets = [0, 64], sizes = [8, 16], strides = [1, 1]} : vector<8x128xf32> to vector<8x16xf32>
    %48 = vector.extract_strided_slice %45 {offsets = [0, 96], sizes = [8, 16], strides = [1, 1]} : vector<8x128xf32> to vector<8x16xf32>
    %cst_25 = arith.constant dense<0.000000e+00> : vector<8x8xf32>
    %49 = tpu.matmul %46, %47, %cst_25 {dimension_numbers = #tpu.dot_dimension_numbers<[1], [1], [0], [0], [0, 0, 1, 0], [], []>} : vector<8x16xf32>, vector<8x16xf32>, vector<8x8xf32> -> vector<8x8xf32>
    %cst_26 = arith.constant 0xFF800000 : f32
    %50 = vector.broadcast %cst_26 : f32 to vector<8x8xf32>
    %51 = arith.select %6, %49, %50 : vector<8x8xi1>, vector<8x8xf32>
    %cst_27 = arith.constant dense<0xFF800000> : vector<8xf32>
    %52 = vector.multi_reduction <maximumf>, %51, %cst_27 [1] : vector<8x8xf32> to vector<8xf32>
    %53 = vector.shape_cast %52 : vector<8xf32> to vector<8x1xf32>
    %54 = vector.broadcast %53 : vector<8x1xf32> to vector<8x8xf32>
    %55 = arith.subf %51, %54 : vector<8x8xf32>
    %56 = math.exp %55 : vector<8x8xf32>
    %cst_28 = arith.constant dense<0.000000e+00> : vector<8xf32>
    %57 = vector.multi_reduction <add>, %56, %cst_28 [1] : vector<8x8xf32> to vector<8xf32>
    %58 = vector.shape_cast %57 : vector<8xf32> to vector<8x1xf32>
    %59 = tpu.reciprocal %58 {approx = true} : vector<8x1xf32> -> vector<8x1xf32>
    %60 = vector.broadcast %59 : vector<8x1xf32> to vector<8x8xf32>
    %61 = arith.mulf %56, %60 : vector<8x8xf32>
    %cst_29 = arith.constant dense<0.000000e+00> : vector<8x16xf32>
    %62 = tpu.matmul %61, %48, %cst_29 {dimension_numbers = #tpu.dot_dimension_numbers<[1], [0], [0], [1], [0, 0, 1, 1], [], []>} : vector<8x8xf32>, vector<8x16xf32>, vector<8x16xf32> -> vector<8x16xf32>
    %63 = vector.extract_strided_slice %45 {offsets = [0, 16], sizes = [8, 16], strides = [1, 1]} : vector<8x128xf32> to vector<8x16xf32>
    %64 = vector.extract_strided_slice %45 {offsets = [0, 64], sizes = [8, 16], strides = [1, 1]} : vector<8x128xf32> to vector<8x16xf32>
    %65 = vector.extract_strided_slice %45 {offsets = [0, 96], sizes = [8, 16], strides = [1, 1]} : vector<8x128xf32> to vector<8x16xf32>
    %cst_30 = arith.constant dense<0.000000e+00> : vector<8x8xf32>
    %66 = tpu.matmul %63, %64, %cst_30 {dimension_numbers = #tpu.dot_dimension_numbers<[1], [1], [0], [0], [0, 0, 1, 0], [], []>} : vector<8x16xf32>, vector<8x16xf32>, vector<8x8xf32> -> vector<8x8xf32>
    %cst_31 = arith.constant 0xFF800000 : f32
    %67 = vector.broadcast %cst_31 : f32 to vector<8x8xf32>
    %68 = arith.select %6, %66, %67 : vector<8x8xi1>, vector<8x8xf32>
    %cst_32 = arith.constant dense<0xFF800000> : vector<8xf32>
    %69 = vector.multi_reduction <maximumf>, %68, %cst_32 [1] : vector<8x8xf32> to vector<8xf32>
    %70 = vector.shape_cast %69 : vector<8xf32> to vector<8x1xf32>
    %71 = vector.broadcast %70 : vector<8x1xf32> to vector<8x8xf32>
    %72 = arith.subf %68, %71 : vector<8x8xf32>
    %73 = math.exp %72 : vector<8x8xf32>
    %cst_33 = arith.constant dense<0.000000e+00> : vector<8xf32>
    %74 = vector.multi_reduction <add>, %73, %cst_33 [1] : vector<8x8xf32> to vector<8xf32>
    %75 = vector.shape_cast %74 : vector<8xf32> to vector<8x1xf32>
    %76 = tpu.reciprocal %75 {approx = true} : vector<8x1xf32> -> vector<8x1xf32>
    %77 = vector.broadcast %76 : vector<8x1xf32> to vector<8x8xf32>
    %78 = arith.mulf %73, %77 : vector<8x8xf32>
    %cst_34 = arith.constant dense<0.000000e+00> : vector<8x16xf32>
    %79 = tpu.matmul %78, %65, %cst_34 {dimension_numbers = #tpu.dot_dimension_numbers<[1], [0], [0], [1], [0, 0, 1, 1], [], []>} : vector<8x8xf32>, vector<8x16xf32>, vector<8x16xf32> -> vector<8x16xf32>
    %80 = vector.extract_strided_slice %45 {offsets = [0, 32], sizes = [8, 16], strides = [1, 1]} : vector<8x128xf32> to vector<8x16xf32>
    %81 = vector.extract_strided_slice %45 {offsets = [0, 80], sizes = [8, 16], strides = [1, 1]} : vector<8x128xf32> to vector<8x16xf32>
    %82 = vector.extract_strided_slice %45 {offsets = [0, 112], sizes = [8, 16], strides = [1, 1]} : vector<8x128xf32> to vector<8x16xf32>
    %cst_35 = arith.constant dense<0.000000e+00> : vector<8x8xf32>
    %83 = tpu.matmul %80, %81, %cst_35 {dimension_numbers = #tpu.dot_dimension_numbers<[1], [1], [0], [0], [0, 0, 1, 0], [], []>} : vector<8x16xf32>, vector<8x16xf32>, vector<8x8xf32> -> vector<8x8xf32>
    %cst_36 = arith.constant 0xFF800000 : f32
    %84 = vector.broadcast %cst_36 : f32 to vector<8x8xf32>
    %85 = arith.select %6, %83, %84 : vector<8x8xi1>, vector<8x8xf32>
    %cst_37 = arith.constant dense<0xFF800000> : vector<8xf32>
    %86 = vector.multi_reduction <maximumf>, %85, %cst_37 [1] : vector<8x8xf32> to vector<8xf32>
    %87 = vector.shape_cast %86 : vector<8xf32> to vector<8x1xf32>
    %88 = vector.broadcast %87 : vector<8x1xf32> to vector<8x8xf32>
    %89 = arith.subf %85, %88 : vector<8x8xf32>
    %90 = math.exp %89 : vector<8x8xf32>
    %cst_38 = arith.constant dense<0.000000e+00> : vector<8xf32>
    %91 = vector.multi_reduction <add>, %90, %cst_38 [1] : vector<8x8xf32> to vector<8xf32>
    %92 = vector.shape_cast %91 : vector<8xf32> to vector<8x1xf32>
    %93 = tpu.reciprocal %92 {approx = true} : vector<8x1xf32> -> vector<8x1xf32>
    %94 = vector.broadcast %93 : vector<8x1xf32> to vector<8x8xf32>
    %95 = arith.mulf %90, %94 : vector<8x8xf32>
    %cst_39 = arith.constant dense<0.000000e+00> : vector<8x16xf32>
    %96 = tpu.matmul %95, %82, %cst_39 {dimension_numbers = #tpu.dot_dimension_numbers<[1], [0], [0], [1], [0, 0, 1, 1], [], []>} : vector<8x8xf32>, vector<8x16xf32>, vector<8x16xf32> -> vector<8x16xf32>
    %97 = vector.extract_strided_slice %45 {offsets = [0, 48], sizes = [8, 16], strides = [1, 1]} : vector<8x128xf32> to vector<8x16xf32>
    %98 = vector.extract_strided_slice %45 {offsets = [0, 80], sizes = [8, 16], strides = [1, 1]} : vector<8x128xf32> to vector<8x16xf32>
    %99 = vector.extract_strided_slice %45 {offsets = [0, 112], sizes = [8, 16], strides = [1, 1]} : vector<8x128xf32> to vector<8x16xf32>
    %cst_40 = arith.constant dense<0.000000e+00> : vector<8x8xf32>
    %100 = tpu.matmul %97, %98, %cst_40 {dimension_numbers = #tpu.dot_dimension_numbers<[1], [1], [0], [0], [0, 0, 1, 0], [], []>} : vector<8x16xf32>, vector<8x16xf32>, vector<8x8xf32> -> vector<8x8xf32>
    %cst_41 = arith.constant 0xFF800000 : f32
    %101 = vector.broadcast %cst_41 : f32 to vector<8x8xf32>
    %102 = arith.select %6, %100, %101 : vector<8x8xi1>, vector<8x8xf32>
    %cst_42 = arith.constant dense<0xFF800000> : vector<8xf32>
    %103 = vector.multi_reduction <maximumf>, %102, %cst_42 [1] : vector<8x8xf32> to vector<8xf32>
    %104 = vector.shape_cast %103 : vector<8xf32> to vector<8x1xf32>
    %105 = vector.broadcast %104 : vector<8x1xf32> to vector<8x8xf32>
    %106 = arith.subf %102, %105 : vector<8x8xf32>
    %107 = math.exp %106 : vector<8x8xf32>
    %cst_43 = arith.constant dense<0.000000e+00> : vector<8xf32>
    %108 = vector.multi_reduction <add>, %107, %cst_43 [1] : vector<8x8xf32> to vector<8xf32>
    %109 = vector.shape_cast %108 : vector<8xf32> to vector<8x1xf32>
    %110 = tpu.reciprocal %109 {approx = true} : vector<8x1xf32> -> vector<8x1xf32>
    %111 = vector.broadcast %110 : vector<8x1xf32> to vector<8x8xf32>
    %112 = arith.mulf %107, %111 : vector<8x8xf32>
    %cst_44 = arith.constant dense<0.000000e+00> : vector<8x16xf32>
    %113 = tpu.matmul %112, %99, %cst_44 {dimension_numbers = #tpu.dot_dimension_numbers<[1], [0], [0], [1], [0, 0, 1, 1], [], []>} : vector<8x8xf32>, vector<8x16xf32>, vector<8x16xf32> -> vector<8x16xf32>
    %114 = tpu.concatenate %62, %79, %96, %113 in 1 : vector<8x16xf32>, vector<8x16xf32>, vector<8x16xf32>, vector<8x16xf32> -> vector<8x64xf32>
    %c0_45 = arith.constant 0 : index
    %c0_46 = arith.constant 0 : index
    %c0_47 = arith.constant 0 : index
    %115 = vector.load %arg5[%c0_45, %c0_46, %c0_47] : memref<2x64x64xf32, #tpu.memory_space<vmem>>, vector<1x64x64xf32>
    %116 = vector.shape_cast %115 : vector<1x64x64xf32> to vector<64x64xf32>
    %cst_48 = arith.constant dense<0.000000e+00> : vector<8x64xf32>
    %117 = tpu.matmul %114, %116, %cst_48 {dimension_numbers = #tpu.dot_dimension_numbers<[1], [1], [0], [0], [0, 0, 1, 0], [], []>} : vector<8x64xf32>, vector<64x64xf32>, vector<8x64xf32> -> vector<8x64xf32>
    %118 = arith.addf %10, %117 : vector<8x64xf32>
    %119 = arith.mulf %118, %118 : vector<8x64xf32>
    %cst_49 = arith.constant dense<0.000000e+00> : vector<8xf32>
    %120 = vector.multi_reduction <add>, %119, %cst_49 [1] : vector<8x64xf32> to vector<8xf32>
    %121 = vector.shape_cast %120 : vector<8xf32> to vector<8x1xf32>
    %cst_50 = arith.constant 6.400000e+01 : f32
    %122 = vector.broadcast %cst_50 : f32 to vector<8x1xf32>
    %123 = arith.divf %121, %122 : vector<8x1xf32>
    %cst_51 = arith.constant 9.99999997E-7 : f32
    %124 = vector.broadcast %cst_51 : f32 to vector<8x1xf32>
    %125 = arith.addf %123, %124 : vector<8x1xf32>
    %126 = math.rsqrt %125 : vector<8x1xf32>
    %127 = vector.broadcast %126 : vector<8x1xf32> to vector<8x64xf32>
    %128 = arith.mulf %118, %127 : vector<8x64xf32>
    %c0_52 = arith.constant 0 : index
    %c0_53 = arith.constant 0 : index
    %c0_54 = arith.constant 0 : index
    %129 = vector.load %arg6[%c0_52, %c0_53, %c0_54] : memref<2x1x64xf32, #tpu.memory_space<vmem>>, vector<1x1x64xf32>
    %130 = vector.shape_cast %129 : vector<1x1x64xf32> to vector<1x64xf32>
    %131 = vector.broadcast %130 : vector<1x64xf32> to vector<8x64xf32>
    %132 = arith.mulf %128, %131 : vector<8x64xf32>
    %c0_55 = arith.constant 0 : index
    %c0_56 = arith.constant 0 : index
    %c0_57 = arith.constant 0 : index
    %133 = vector.load %arg7[%c0_55, %c0_56, %c0_57] : memref<2x256x64xf32, #tpu.memory_space<vmem>>, vector<1x256x64xf32>
    %134 = vector.shape_cast %133 : vector<1x256x64xf32> to vector<256x64xf32>
    %cst_58 = arith.constant dense<0.000000e+00> : vector<8x256xf32>
    %135 = tpu.matmul %132, %134, %cst_58 {dimension_numbers = #tpu.dot_dimension_numbers<[1], [1], [0], [0], [0, 0, 1, 0], [], []>} : vector<8x64xf32>, vector<256x64xf32>, vector<8x256xf32> -> vector<8x256xf32>
    %136 = vector.extract_strided_slice %135 {offsets = [0, 0], sizes = [8, 128], strides = [1, 1]} : vector<8x256xf32> to vector<8x128xf32>
    %137 = vector.extract_strided_slice %135 {offsets = [0, 128], sizes = [8, 128], strides = [1, 1]} : vector<8x256xf32> to vector<8x128xf32>
    %138 = arith.negf %136 : vector<8x128xf32>
    %139 = math.exp %138 : vector<8x128xf32>
    %cst_59 = arith.constant 1.000000e+00 : f32
    %140 = vector.broadcast %cst_59 : f32 to vector<8x128xf32>
    %141 = arith.addf %140, %139 : vector<8x128xf32>
    %142 = arith.divf %140, %141 : vector<8x128xf32>
    %143 = arith.mulf %136, %142 : vector<8x128xf32>
    %144 = arith.mulf %143, %137 : vector<8x128xf32>
    %c0_60 = arith.constant 0 : index
    %c0_61 = arith.constant 0 : index
    %c0_62 = arith.constant 0 : index
    %145 = vector.load %arg8[%c0_60, %c0_61, %c0_62] : memref<2x64x128xf32, #tpu.memory_space<vmem>>, vector<1x64x128xf32>
    %146 = vector.shape_cast %145 : vector<1x64x128xf32> to vector<64x128xf32>
    %cst_63 = arith.constant dense<0.000000e+00> : vector<8x64xf32>
    %147 = tpu.matmul %144, %146, %cst_63 {dimension_numbers = #tpu.dot_dimension_numbers<[1], [1], [0], [0], [0, 0, 1, 0], [], []>} : vector<8x128xf32>, vector<64x128xf32>, vector<8x64xf32> -> vector<8x64xf32>
    %148 = arith.addf %118, %147 : vector<8x64xf32>
    %149 = arith.mulf %148, %148 : vector<8x64xf32>
    %cst_64 = arith.constant dense<0.000000e+00> : vector<8xf32>
    %150 = vector.multi_reduction <add>, %149, %cst_64 [1] : vector<8x64xf32> to vector<8xf32>
    %151 = vector.shape_cast %150 : vector<8xf32> to vector<8x1xf32>
    %cst_65 = arith.constant 6.400000e+01 : f32
    %152 = vector.broadcast %cst_65 : f32 to vector<8x1xf32>
    %153 = arith.divf %151, %152 : vector<8x1xf32>
    %cst_66 = arith.constant 9.99999997E-7 : f32
    %154 = vector.broadcast %cst_66 : f32 to vector<8x1xf32>
    %155 = arith.addf %153, %154 : vector<8x1xf32>
    %156 = math.rsqrt %155 : vector<8x1xf32>
    %157 = vector.broadcast %156 : vector<8x1xf32> to vector<8x64xf32>
    %158 = arith.mulf %148, %157 : vector<8x64xf32>
    %c1 = arith.constant 1 : index
    %c0_67 = arith.constant 0 : index
    %c0_68 = arith.constant 0 : index
    %159 = vector.load %arg2[%c1, %c0_67, %c0_68] : memref<2x1x64xf32, #tpu.memory_space<vmem>>, vector<1x1x64xf32>
    %160 = vector.shape_cast %159 : vector<1x1x64xf32> to vector<1x64xf32>
    %161 = vector.broadcast %160 : vector<1x64xf32> to vector<8x64xf32>
    %162 = arith.mulf %158, %161 : vector<8x64xf32>
    %c1_69 = arith.constant 1 : index
    %c0_70 = arith.constant 0 : index
    %c0_71 = arith.constant 0 : index
    %163 = vector.load %arg3[%c1_69, %c0_70, %c0_71] : memref<2x128x64xf32, #tpu.memory_space<vmem>>, vector<1x128x64xf32>
    %164 = vector.shape_cast %163 : vector<1x128x64xf32> to vector<128x64xf32>
    %cst_72 = arith.constant dense<0.000000e+00> : vector<8x128xf32>
    %165 = tpu.matmul %162, %164, %cst_72 {dimension_numbers = #tpu.dot_dimension_numbers<[1], [1], [0], [0], [0, 0, 1, 0], [], []>} : vector<8x64xf32>, vector<128x64xf32>, vector<8x128xf32> -> vector<8x128xf32>
    %166 = arith.mulf %165, %165 : vector<8x128xf32>
    %cst_73 = arith.constant dense<0.000000e+00> : vector<8x128xf32>
    %167 = tpu.matmul %166, %2, %cst_73 {dimension_numbers = #tpu.dot_dimension_numbers<[1], [0], [0], [1], [0, 0, 1, 1], [], []>} : vector<8x128xf32>, vector<128x128xf32>, vector<8x128xf32> -> vector<8x128xf32>
    %cst_74 = arith.constant 9.99999997E-7 : f32
    %168 = vector.broadcast %cst_74 : f32 to vector<8x128xf32>
    %169 = arith.addf %167, %168 : vector<8x128xf32>
    %170 = math.rsqrt %169 : vector<8x128xf32>
    %cst_75 = arith.constant 1.000000e+00 : f32
    %171 = vector.shape_cast %9 : vector<1x128xi1> to vector<1x128xi1>
    %172 = vector.broadcast %171 : vector<1x128xi1> to vector<8x128xi1>
    %173 = vector.broadcast %cst_75 : f32 to vector<8x128xf32>
    %174 = arith.select %172, %170, %173 : vector<8x128xi1>, vector<8x128xf32>
    %175 = arith.mulf %165, %174 : vector<8x128xf32>
    %c1_76 = arith.constant 1 : index
    %c0_77 = arith.constant 0 : index
    %c0_78 = arith.constant 0 : index
    %176 = vector.load %arg4[%c1_76, %c0_77, %c0_78] : memref<2x1x128xf32, #tpu.memory_space<vmem>>, vector<1x1x128xf32>
    %177 = vector.shape_cast %176 : vector<1x1x128xf32> to vector<1x128xf32>
    %178 = vector.broadcast %177 : vector<1x128xf32> to vector<8x128xf32>
    %179 = arith.mulf %175, %178 : vector<8x128xf32>
    %cst_79 = arith.constant dense<0.000000e+00> : vector<8x128xf32>
    %180 = tpu.matmul %179, %3, %cst_79 {dimension_numbers = #tpu.dot_dimension_numbers<[1], [0], [0], [1], [0, 0, 1, 1], [], []>} : vector<8x128xf32>, vector<128x128xf32>, vector<8x128xf32> -> vector<8x128xf32>
    %181 = arith.mulf %179, %0 : vector<8x128xf32>
    %182 = arith.mulf %180, %1 : vector<8x128xf32>
    %183 = arith.addf %181, %182 : vector<8x128xf32>
    %184 = vector.extract_strided_slice %183 {offsets = [0, 0], sizes = [8, 16], strides = [1, 1]} : vector<8x128xf32> to vector<8x16xf32>
    %185 = vector.extract_strided_slice %183 {offsets = [0, 64], sizes = [8, 16], strides = [1, 1]} : vector<8x128xf32> to vector<8x16xf32>
    %186 = vector.extract_strided_slice %183 {offsets = [0, 96], sizes = [8, 16], strides = [1, 1]} : vector<8x128xf32> to vector<8x16xf32>
    %cst_80 = arith.constant dense<0.000000e+00> : vector<8x8xf32>
    %187 = tpu.matmul %184, %185, %cst_80 {dimension_numbers = #tpu.dot_dimension_numbers<[1], [1], [0], [0], [0, 0, 1, 0], [], []>} : vector<8x16xf32>, vector<8x16xf32>, vector<8x8xf32> -> vector<8x8xf32>
    %cst_81 = arith.constant 0xFF800000 : f32
    %188 = vector.broadcast %cst_81 : f32 to vector<8x8xf32>
    %189 = arith.select %6, %187, %188 : vector<8x8xi1>, vector<8x8xf32>
    %cst_82 = arith.constant dense<0xFF800000> : vector<8xf32>
    %190 = vector.multi_reduction <maximumf>, %189, %cst_82 [1] : vector<8x8xf32> to vector<8xf32>
    %191 = vector.shape_cast %190 : vector<8xf32> to vector<8x1xf32>
    %192 = vector.broadcast %191 : vector<8x1xf32> to vector<8x8xf32>
    %193 = arith.subf %189, %192 : vector<8x8xf32>
    %194 = math.exp %193 : vector<8x8xf32>
    %cst_83 = arith.constant dense<0.000000e+00> : vector<8xf32>
    %195 = vector.multi_reduction <add>, %194, %cst_83 [1] : vector<8x8xf32> to vector<8xf32>
    %196 = vector.shape_cast %195 : vector<8xf32> to vector<8x1xf32>
    %197 = tpu.reciprocal %196 {approx = true} : vector<8x1xf32> -> vector<8x1xf32>
    %198 = vector.broadcast %197 : vector<8x1xf32> to vector<8x8xf32>
    %199 = arith.mulf %194, %198 : vector<8x8xf32>
    %cst_84 = arith.constant dense<0.000000e+00> : vector<8x16xf32>
    %200 = tpu.matmul %199, %186, %cst_84 {dimension_numbers = #tpu.dot_dimension_numbers<[1], [0], [0], [1], [0, 0, 1, 1], [], []>} : vector<8x8xf32>, vector<8x16xf32>, vector<8x16xf32> -> vector<8x16xf32>
    %201 = vector.extract_strided_slice %183 {offsets = [0, 16], sizes = [8, 16], strides = [1, 1]} : vector<8x128xf32> to vector<8x16xf32>
    %202 = vector.extract_strided_slice %183 {offsets = [0, 64], sizes = [8, 16], strides = [1, 1]} : vector<8x128xf32> to vector<8x16xf32>
    %203 = vector.extract_strided_slice %183 {offsets = [0, 96], sizes = [8, 16], strides = [1, 1]} : vector<8x128xf32> to vector<8x16xf32>
    %cst_85 = arith.constant dense<0.000000e+00> : vector<8x8xf32>
    %204 = tpu.matmul %201, %202, %cst_85 {dimension_numbers = #tpu.dot_dimension_numbers<[1], [1], [0], [0], [0, 0, 1, 0], [], []>} : vector<8x16xf32>, vector<8x16xf32>, vector<8x8xf32> -> vector<8x8xf32>
    %cst_86 = arith.constant 0xFF800000 : f32
    %205 = vector.broadcast %cst_86 : f32 to vector<8x8xf32>
    %206 = arith.select %6, %204, %205 : vector<8x8xi1>, vector<8x8xf32>
    %cst_87 = arith.constant dense<0xFF800000> : vector<8xf32>
    %207 = vector.multi_reduction <maximumf>, %206, %cst_87 [1] : vector<8x8xf32> to vector<8xf32>
    %208 = vector.shape_cast %207 : vector<8xf32> to vector<8x1xf32>
    %209 = vector.broadcast %208 : vector<8x1xf32> to vector<8x8xf32>
    %210 = arith.subf %206, %209 : vector<8x8xf32>
    %211 = math.exp %210 : vector<8x8xf32>
    %cst_88 = arith.constant dense<0.000000e+00> : vector<8xf32>
    %212 = vector.multi_reduction <add>, %211, %cst_88 [1] : vector<8x8xf32> to vector<8xf32>
    %213 = vector.shape_cast %212 : vector<8xf32> to vector<8x1xf32>
    %214 = tpu.reciprocal %213 {approx = true} : vector<8x1xf32> -> vector<8x1xf32>
    %215 = vector.broadcast %214 : vector<8x1xf32> to vector<8x8xf32>
    %216 = arith.mulf %211, %215 : vector<8x8xf32>
    %cst_89 = arith.constant dense<0.000000e+00> : vector<8x16xf32>
    %217 = tpu.matmul %216, %203, %cst_89 {dimension_numbers = #tpu.dot_dimension_numbers<[1], [0], [0], [1], [0, 0, 1, 1], [], []>} : vector<8x8xf32>, vector<8x16xf32>, vector<8x16xf32> -> vector<8x16xf32>
    %218 = vector.extract_strided_slice %183 {offsets = [0, 32], sizes = [8, 16], strides = [1, 1]} : vector<8x128xf32> to vector<8x16xf32>
    %219 = vector.extract_strided_slice %183 {offsets = [0, 80], sizes = [8, 16], strides = [1, 1]} : vector<8x128xf32> to vector<8x16xf32>
    %220 = vector.extract_strided_slice %183 {offsets = [0, 112], sizes = [8, 16], strides = [1, 1]} : vector<8x128xf32> to vector<8x16xf32>
    %cst_90 = arith.constant dense<0.000000e+00> : vector<8x8xf32>
    %221 = tpu.matmul %218, %219, %cst_90 {dimension_numbers = #tpu.dot_dimension_numbers<[1], [1], [0], [0], [0, 0, 1, 0], [], []>} : vector<8x16xf32>, vector<8x16xf32>, vector<8x8xf32> -> vector<8x8xf32>
    %cst_91 = arith.constant 0xFF800000 : f32
    %222 = vector.broadcast %cst_91 : f32 to vector<8x8xf32>
    %223 = arith.select %6, %221, %222 : vector<8x8xi1>, vector<8x8xf32>
    %cst_92 = arith.constant dense<0xFF800000> : vector<8xf32>
    %224 = vector.multi_reduction <maximumf>, %223, %cst_92 [1] : vector<8x8xf32> to vector<8xf32>
    %225 = vector.shape_cast %224 : vector<8xf32> to vector<8x1xf32>
    %226 = vector.broadcast %225 : vector<8x1xf32> to vector<8x8xf32>
    %227 = arith.subf %223, %226 : vector<8x8xf32>
    %228 = math.exp %227 : vector<8x8xf32>
    %cst_93 = arith.constant dense<0.000000e+00> : vector<8xf32>
    %229 = vector.multi_reduction <add>, %228, %cst_93 [1] : vector<8x8xf32> to vector<8xf32>
    %230 = vector.shape_cast %229 : vector<8xf32> to vector<8x1xf32>
    %231 = tpu.reciprocal %230 {approx = true} : vector<8x1xf32> -> vector<8x1xf32>
    %232 = vector.broadcast %231 : vector<8x1xf32> to vector<8x8xf32>
    %233 = arith.mulf %228, %232 : vector<8x8xf32>
    %cst_94 = arith.constant dense<0.000000e+00> : vector<8x16xf32>
    %234 = tpu.matmul %233, %220, %cst_94 {dimension_numbers = #tpu.dot_dimension_numbers<[1], [0], [0], [1], [0, 0, 1, 1], [], []>} : vector<8x8xf32>, vector<8x16xf32>, vector<8x16xf32> -> vector<8x16xf32>
    %235 = vector.extract_strided_slice %183 {offsets = [0, 48], sizes = [8, 16], strides = [1, 1]} : vector<8x128xf32> to vector<8x16xf32>
    %236 = vector.extract_strided_slice %183 {offsets = [0, 80], sizes = [8, 16], strides = [1, 1]} : vector<8x128xf32> to vector<8x16xf32>
    %237 = vector.extract_strided_slice %183 {offsets = [0, 112], sizes = [8, 16], strides = [1, 1]} : vector<8x128xf32> to vector<8x16xf32>
    %cst_95 = arith.constant dense<0.000000e+00> : vector<8x8xf32>
    %238 = tpu.matmul %235, %236, %cst_95 {dimension_numbers = #tpu.dot_dimension_numbers<[1], [1], [0], [0], [0, 0, 1, 0], [], []>} : vector<8x16xf32>, vector<8x16xf32>, vector<8x8xf32> -> vector<8x8xf32>
    %cst_96 = arith.constant 0xFF800000 : f32
    %239 = vector.broadcast %cst_96 : f32 to vector<8x8xf32>
    %240 = arith.select %6, %238, %239 : vector<8x8xi1>, vector<8x8xf32>
    %cst_97 = arith.constant dense<0xFF800000> : vector<8xf32>
    %241 = vector.multi_reduction <maximumf>, %240, %cst_97 [1] : vector<8x8xf32> to vector<8xf32>
    %242 = vector.shape_cast %241 : vector<8xf32> to vector<8x1xf32>
    %243 = vector.broadcast %242 : vector<8x1xf32> to vector<8x8xf32>
    %244 = arith.subf %240, %243 : vector<8x8xf32>
    %245 = math.exp %244 : vector<8x8xf32>
    %cst_98 = arith.constant dense<0.000000e+00> : vector<8xf32>
    %246 = vector.multi_reduction <add>, %245, %cst_98 [1] : vector<8x8xf32> to vector<8xf32>
    %247 = vector.shape_cast %246 : vector<8xf32> to vector<8x1xf32>
    %248 = tpu.reciprocal %247 {approx = true} : vector<8x1xf32> -> vector<8x1xf32>
    %249 = vector.broadcast %248 : vector<8x1xf32> to vector<8x8xf32>
    %250 = arith.mulf %245, %249 : vector<8x8xf32>
    %cst_99 = arith.constant dense<0.000000e+00> : vector<8x16xf32>
    %251 = tpu.matmul %250, %237, %cst_99 {dimension_numbers = #tpu.dot_dimension_numbers<[1], [0], [0], [1], [0, 0, 1, 1], [], []>} : vector<8x8xf32>, vector<8x16xf32>, vector<8x16xf32> -> vector<8x16xf32>
    %252 = tpu.concatenate %200, %217, %234, %251 in 1 : vector<8x16xf32>, vector<8x16xf32>, vector<8x16xf32>, vector<8x16xf32> -> vector<8x64xf32>
    %c1_100 = arith.constant 1 : index
    %c0_101 = arith.constant 0 : index
    %c0_102 = arith.constant 0 : index
    %253 = vector.load %arg5[%c1_100, %c0_101, %c0_102] : memref<2x64x64xf32, #tpu.memory_space<vmem>>, vector<1x64x64xf32>
    %254 = vector.shape_cast %253 : vector<1x64x64xf32> to vector<64x64xf32>
    %cst_103 = arith.constant dense<0.000000e+00> : vector<8x64xf32>
    %255 = tpu.matmul %252, %254, %cst_103 {dimension_numbers = #tpu.dot_dimension_numbers<[1], [1], [0], [0], [0, 0, 1, 0], [], []>} : vector<8x64xf32>, vector<64x64xf32>, vector<8x64xf32> -> vector<8x64xf32>
    %256 = arith.addf %148, %255 : vector<8x64xf32>
    %257 = arith.mulf %256, %256 : vector<8x64xf32>
    %cst_104 = arith.constant dense<0.000000e+00> : vector<8xf32>
    %258 = vector.multi_reduction <add>, %257, %cst_104 [1] : vector<8x64xf32> to vector<8xf32>
    %259 = vector.shape_cast %258 : vector<8xf32> to vector<8x1xf32>
    %cst_105 = arith.constant 6.400000e+01 : f32
    %260 = vector.broadcast %cst_105 : f32 to vector<8x1xf32>
    %261 = arith.divf %259, %260 : vector<8x1xf32>
    %cst_106 = arith.constant 9.99999997E-7 : f32
    %262 = vector.broadcast %cst_106 : f32 to vector<8x1xf32>
    %263 = arith.addf %261, %262 : vector<8x1xf32>
    %264 = math.rsqrt %263 : vector<8x1xf32>
    %265 = vector.broadcast %264 : vector<8x1xf32> to vector<8x64xf32>
    %266 = arith.mulf %256, %265 : vector<8x64xf32>
    %c1_107 = arith.constant 1 : index
    %c0_108 = arith.constant 0 : index
    %c0_109 = arith.constant 0 : index
    %267 = vector.load %arg6[%c1_107, %c0_108, %c0_109] : memref<2x1x64xf32, #tpu.memory_space<vmem>>, vector<1x1x64xf32>
    %268 = vector.shape_cast %267 : vector<1x1x64xf32> to vector<1x64xf32>
    %269 = vector.broadcast %268 : vector<1x64xf32> to vector<8x64xf32>
    %270 = arith.mulf %266, %269 : vector<8x64xf32>
    %c1_110 = arith.constant 1 : index
    %c0_111 = arith.constant 0 : index
    %c0_112 = arith.constant 0 : index
    %271 = vector.load %arg7[%c1_110, %c0_111, %c0_112] : memref<2x256x64xf32, #tpu.memory_space<vmem>>, vector<1x256x64xf32>
    %272 = vector.shape_cast %271 : vector<1x256x64xf32> to vector<256x64xf32>
    %cst_113 = arith.constant dense<0.000000e+00> : vector<8x256xf32>
    %273 = tpu.matmul %270, %272, %cst_113 {dimension_numbers = #tpu.dot_dimension_numbers<[1], [1], [0], [0], [0, 0, 1, 0], [], []>} : vector<8x64xf32>, vector<256x64xf32>, vector<8x256xf32> -> vector<8x256xf32>
    %274 = vector.extract_strided_slice %273 {offsets = [0, 0], sizes = [8, 128], strides = [1, 1]} : vector<8x256xf32> to vector<8x128xf32>
    %275 = vector.extract_strided_slice %273 {offsets = [0, 128], sizes = [8, 128], strides = [1, 1]} : vector<8x256xf32> to vector<8x128xf32>
    %276 = arith.negf %274 : vector<8x128xf32>
    %277 = math.exp %276 : vector<8x128xf32>
    %cst_114 = arith.constant 1.000000e+00 : f32
    %278 = vector.broadcast %cst_114 : f32 to vector<8x128xf32>
    %279 = arith.addf %278, %277 : vector<8x128xf32>
    %280 = arith.divf %278, %279 : vector<8x128xf32>
    %281 = arith.mulf %274, %280 : vector<8x128xf32>
    %282 = arith.mulf %281, %275 : vector<8x128xf32>
    %c1_115 = arith.constant 1 : index
    %c0_116 = arith.constant 0 : index
    %c0_117 = arith.constant 0 : index
    %283 = vector.load %arg8[%c1_115, %c0_116, %c0_117] : memref<2x64x128xf32, #tpu.memory_space<vmem>>, vector<1x64x128xf32>
    %284 = vector.shape_cast %283 : vector<1x64x128xf32> to vector<64x128xf32>
    %cst_118 = arith.constant dense<0.000000e+00> : vector<8x64xf32>
    %285 = tpu.matmul %282, %284, %cst_118 {dimension_numbers = #tpu.dot_dimension_numbers<[1], [1], [0], [0], [0, 0, 1, 0], [], []>} : vector<8x128xf32>, vector<64x128xf32>, vector<8x64xf32> -> vector<8x64xf32>
    %286 = arith.addf %256, %285 : vector<8x64xf32>
    %287 = arith.mulf %286, %286 : vector<8x64xf32>
    %cst_119 = arith.constant dense<0.000000e+00> : vector<8xf32>
    %288 = vector.multi_reduction <add>, %287, %cst_119 [1] : vector<8x64xf32> to vector<8xf32>
    %289 = vector.shape_cast %288 : vector<8xf32> to vector<8x1xf32>
    %cst_120 = arith.constant 6.400000e+01 : f32
    %290 = vector.broadcast %cst_120 : f32 to vector<8x1xf32>
    %291 = arith.divf %289, %290 : vector<8x1xf32>
    %cst_121 = arith.constant 9.99999997E-7 : f32
    %292 = vector.broadcast %cst_121 : f32 to vector<8x1xf32>
    %293 = arith.addf %291, %292 : vector<8x1xf32>
    %294 = math.rsqrt %293 : vector<8x1xf32>
    %295 = vector.broadcast %294 : vector<8x1xf32> to vector<8x64xf32>
    %296 = arith.mulf %286, %295 : vector<8x64xf32>
    %c0_122 = arith.constant 0 : index
    %c0_123 = arith.constant 0 : index
    %297 = vector.load %arg9[%c0_122, %c0_123] : memref<1x64xf32, #tpu.memory_space<vmem>>, vector<1x64xf32>
    %298 = vector.broadcast %297 : vector<1x64xf32> to vector<8x64xf32>
    %299 = arith.mulf %296, %298 : vector<8x64xf32>
    %c0_124 = arith.constant 0 : index
    %c0_125 = arith.constant 0 : index
    %300 = vector.load %arg10[%c0_124, %c0_125] : memref<256x64xf32, #tpu.memory_space<vmem>>, vector<256x64xf32>
    %cst_126 = arith.constant dense<0.000000e+00> : vector<8x256xf32>
    %301 = tpu.matmul %299, %300, %cst_126 {dimension_numbers = #tpu.dot_dimension_numbers<[1], [1], [0], [0], [0, 0, 1, 0], [], []>} : vector<8x64xf32>, vector<256x64xf32>, vector<8x256xf32> -> vector<8x256xf32>
    %c0_127 = arith.constant 0 : index
    %c0_128 = arith.constant 0 : index
    %302 = vector.load %arg15[%c0_127, %c0_128] : memref<8x256xf32, #tpu.memory_space<vmem>>, vector<8x256xf32>
    tpu.vector_store %arg15[%c0_127, %c0_128], %301 {strides = array<i32>} : memref<8x256xf32, #tpu.memory_space<vmem>>, vector<8x256xf32>,
    return
  }
  func.func @transform_0(%arg0: i32) -> (i32, i32) {
    %c0_i32 = arith.constant 0 : i32
    %c0_i32_0 = arith.constant 0 : i32
    return %arg0, %c0_i32 : i32, i32
  }
  func.func @transform_1(%arg0: i32) -> (i32, i32, i32) {
    %c0_i32 = arith.constant 0 : i32
    %c0_i32_0 = arith.constant 0 : i32
    %c0_i32_1 = arith.constant 0 : i32
    %c0_i32_2 = arith.constant 0 : i32
    return %c0_i32, %c0_i32_0, %c0_i32_1 : i32, i32, i32
  }
  func.func @transform_2(%arg0: i32) -> (i32, i32, i32) {
    %c0_i32 = arith.constant 0 : i32
    %c0_i32_0 = arith.constant 0 : i32
    %c0_i32_1 = arith.constant 0 : i32
    %c0_i32_2 = arith.constant 0 : i32
    return %c0_i32, %c0_i32_0, %c0_i32_1 : i32, i32, i32
  }
  func.func @transform_3(%arg0: i32) -> (i32, i32, i32) {
    %c0_i32 = arith.constant 0 : i32
    %c0_i32_0 = arith.constant 0 : i32
    %c0_i32_1 = arith.constant 0 : i32
    %c0_i32_2 = arith.constant 0 : i32
    return %c0_i32, %c0_i32_0, %c0_i32_1 : i32, i32, i32
  }
  func.func @transform_4(%arg0: i32) -> (i32, i32, i32) {
    %c0_i32 = arith.constant 0 : i32
    %c0_i32_0 = arith.constant 0 : i32
    %c0_i32_1 = arith.constant 0 : i32
    %c0_i32_2 = arith.constant 0 : i32
    return %c0_i32, %c0_i32_0, %c0_i32_1 : i32, i32, i32
  }
  func.func @transform_5(%arg0: i32) -> (i32, i32, i32) {
    %c0_i32 = arith.constant 0 : i32
    %c0_i32_0 = arith.constant 0 : i32
    %c0_i32_1 = arith.constant 0 : i32
    %c0_i32_2 = arith.constant 0 : i32
    return %c0_i32, %c0_i32_0, %c0_i32_1 : i32, i32, i32
  }
  func.func @transform_6(%arg0: i32) -> (i32, i32, i32) {
    %c0_i32 = arith.constant 0 : i32
    %c0_i32_0 = arith.constant 0 : i32
    %c0_i32_1 = arith.constant 0 : i32
    %c0_i32_2 = arith.constant 0 : i32
    return %c0_i32, %c0_i32_0, %c0_i32_1 : i32, i32, i32
  }
  func.func @transform_7(%arg0: i32) -> (i32, i32, i32) {
    %c0_i32 = arith.constant 0 : i32
    %c0_i32_0 = arith.constant 0 : i32
    %c0_i32_1 = arith.constant 0 : i32
    %c0_i32_2 = arith.constant 0 : i32
    return %c0_i32, %c0_i32_0, %c0_i32_1 : i32, i32, i32
  }
  func.func @transform_8(%arg0: i32) -> (i32, i32) {
    %c0_i32 = arith.constant 0 : i32
    %c0_i32_0 = arith.constant 0 : i32
    %c0_i32_1 = arith.constant 0 : i32
    return %c0_i32, %c0_i32_0 : i32, i32
  }
  func.func @transform_9(%arg0: i32) -> (i32, i32) {
    %c0_i32 = arith.constant 0 : i32
    %c0_i32_0 = arith.constant 0 : i32
    %c0_i32_1 = arith.constant 0 : i32
    return %c0_i32, %c0_i32_0 : i32, i32
  }
  func.func @transform_10(%arg0: i32) -> (i32, i32) {
    %c0_i32 = arith.constant 0 : i32
    %c0_i32_0 = arith.constant 0 : i32
    %c0_i32_1 = arith.constant 0 : i32
    return %c0_i32, %c0_i32_0 : i32, i32
  }
  func.func @transform_11(%arg0: i32) -> (i32, i32) {
    %c0_i32 = arith.constant 0 : i32
    %c0_i32_0 = arith.constant 0 : i32
    %c0_i32_1 = arith.constant 0 : i32
    return %c0_i32, %c0_i32_0 : i32, i32
  }
  func.func @transform_12(%arg0: i32) -> (i32, i32) {
    %c0_i32 = arith.constant 0 : i32
    %c0_i32_0 = arith.constant 0 : i32
    %c0_i32_1 = arith.constant 0 : i32
    return %c0_i32, %c0_i32_0 : i32, i32
  }
  func.func @transform_13(%arg0: i32) -> (i32, i32) {
    %c0_i32 = arith.constant 0 : i32
    %c0_i32_0 = arith.constant 0 : i32
    %c0_i32_1 = arith.constant 0 : i32
    return %c0_i32, %c0_i32_0 : i32, i32
  }
  func.func @transform_14(%arg0: i32) -> (i32, i32) {
    %c0_i32 = arith.constant 0 : i32
    %c0_i32_0 = arith.constant 0 : i32
    return %arg0, %c0_i32 : i32, i32
  }
}

</mosaic_0001>

<bundles_post_ra>
// kernel: tile.14
= control target key start
LH: loop header
LB: loop body
LE: loop exit
PB: predicated region body
PF: predicated region fallthrough
CT: control target
= control target key end

     0   :  { %vm4_vm0 = vcmask 1047556   ;;  %s73_s14 = smov 80   ;;  %s74_s19 = smov 48   ;;  %vm6_vm1 = vcmask 130048   ;;  %vm16_vm2 = vcmask 786048   ;;  %vm26_vm3 = vcmask 654848   ;;  %s148_s0 = inlined_call_operand.vmem [shape: f32[8,6,16], index: 0, kind: input, shape index: {}]   ;;  %s149_s1 = inlined_call_operand.vmem [shape: f32[8,96], index: 1, kind: output, shape index: {}]  }
   0x1   :  { %v58_v0 = vld [vmem:[%s148_s0 + $0x5] ss:$8 sm:$0xf]   ;;  %v62_v3 = vld [vmem:[%s148_s0 + $0x3] ss:$8 sm:$0xf]  }
   0x2   :  { %v59_v1 = vld [vmem:[%s148_s0 + $0x5] ss:$8 sm:$0xf0]   ;;  %v63_v4 = vld [vmem:[%s148_s0 + $0x3] ss:$8 sm:$0xf0]  }
   0x3   :  { %v13_v2 = vsel %vm4_vm0, %v59_v1, %v58_v0  ;;  %v33_v5 = vsel %vm4_vm0, %v63_v4, %v62_v3  ;;  %v60_v6 = vld [vmem:[%s148_s0 + $0x4] ss:$8 sm:$0xf]   ;;  %v64_v9 = vld [vmem:[%s148_s0 + $0x2] ss:$8 sm:$0xf]  }
   0x4   :  { %14 = vrot.lane.b32.xlu0 %v13_v2, %s73_s14  ;;  %v61_v7 = vld [vmem:[%s148_s0 + $0x4] ss:$8 sm:$0xf0]   ;;  %34 = vrot.lane.b32.xlu1 %v33_v5, %s74_s19  ;;  %v65_v10 = vld [vmem:[%s148_s0 + $0x2] ss:$8 sm:$0xf0]  }
   0x5   :  { %v23_v8 = vsel %vm4_vm0, %v61_v7, %v60_v6  ;;  %v66_v11 = vld [vmem:[%s148_s0 + $0x1] ss:$8 sm:$0xf]   ;;  %v43_v12 = vsel %vm4_vm0, %v65_v10, %v64_v9  ;;  %s75_s28 = smov 64   ;;  %s77_s6 = smov 16   ;;  %vm36_vm4 = vcmask 523648  }
   0x6   :  { %v67_v13 = vld [vmem:[%s148_s0 + $0x1] ss:$8 sm:$0xf0]   ;;  %v2_v14 = vld [vmem:[%s148_s0] ss:$8 sm:$0xf]  }
   0x7   :  { %v3_v15 = vld [vmem:[%s148_s0] ss:$8 sm:$0xf0]   ;;  %s76_s0 = smov 32   ;;  %v53_v16 = vsel %vm4_vm0, %v67_v13, %v66_v11  ;;  %vm46_vm5 = vcmask 392448   ;;  %vm56_vm6 = vcmask 261248  }
   0x8   :  { %24 = vrot.lane.b32.xlu0 %v23_v8, %s75_s28  ;;  %44 = vrot.lane.b32.xlu1 %v43_v12, %s76_s0  ;;  %v5_v17 = vsel %vm4_vm0, %v3_v15, %v2_v14 }
   0x9   :  { %7 = vst.msk [vmem:[%s149_s1] sm:$0xff] %vm6_vm1, %v5_v17  }
   0xc   :  { %54 = vrot.lane.b32.xlu0 %v53_v16, %s77_s6 }
  0x76   :  { %v15_v18 = vpop.permute.xlu0 %14   ;;  %v35_v19 = vpop.permute.xlu1 %34  }
  0x77   :  { %17 = vst.msk [vmem:[%s149_s1] sm:$0xff] %vm16_vm2, %v15_v18  }
  0x7a   :  { %v25_v20 = vpop.permute.xlu0 %24   ;;  %v45_v21 = vpop.permute.xlu1 %44  }
  0x7b   :  { %27 = vst.msk [vmem:[%s149_s1] sm:$0xff] %vm26_vm3, %v25_v20  }
  0x7c   :  { %37 = vst.msk [vmem:[%s149_s1] sm:$0xff] %vm36_vm4, %v35_v19  }
  0x7d   :  { %47 = vst.msk [vmem:[%s149_s1] sm:$0xff] %vm46_vm5, %v45_v21  }
  0x7e   :  { %v55_v22 = vpop.permute.xlu0 %54  }
  0x7f   :  { %57 = vst.msk [vmem:[%s149_s1] sm:$0xff] %vm56_vm6, %v55_v22  }

// kernel: _lambda_.1
= control target key start
LH: loop header
LB: loop body
LE: loop exit
PB: predicated region body
PF: predicated region fallthrough
CT: control target
= control target key end

     0   :  { %s6303_s0 = inlined_call_operand.vmem [shape: f32[16,64], index: 0, kind: input, shape index: {}]   ;;  %s6304_s1 = inlined_call_operand.vmem [shape: f32[2,1,64], index: 1, kind: input, shape index: {}]   ;;  %s6305_s2 = inlined_call_operand.vmem [shape: f32[2,128,64], index: 2, kind: input, shape index: {}]   ;;  %s6306_s3 = inlined_call_operand.vmem [shape: f32[2,1,128], index: 3, kind: input, shape index: {}]   ;;  %s6307_s4 = inlined_call_operand.vmem [shape: f32[2,64,64], index: 4, kind: input, shape index: {}]   ;;  %s6308_s5 = inlined_call_operand.vmem [shape: f32[2,1,64], index: 5, kind: input, shape index: {}]   ;;  %s6309_s6 = inlined_call_operand.vmem [shape: f32[2,256,64], index: 6, kind: input, shape index: {}]   ;;  %s6310_s7 = inlined_call_operand.vmem [shape: f32[2,64,128], index: 7, kind: input, shape index: {}]   ;;  %s6311_s8 = inlined_call_operand.vmem [shape: f32[1,64], index: 8, kind: input, shape index: {}]   ;;  %s6312_s9 = inlined_call_operand.vmem [shape: f32[256,64], index: 9, kind: input, shape index: {}]   ;;  %s6313_s10 = inlined_call_operand.vmem [shape: f32[8,128], index: 10, kind: input, shape index: {}]   ;;  %s6314_s11 = inlined_call_operand.vmem [shape: f32[8,128], index: 11, kind: input, shape index: {}]   ;;  %s6315_s12 = inlined_call_operand.vmem [shape: f32[128,128], index: 12, kind: input, shape index: {}]   ;;  %s6316_s13 = inlined_call_operand.vmem [shape: f32[128,128], index: 13, kind: input, shape index: {}]   ;;  %s6317_s14 = inlined_call_operand.hbm [shape: f32[16,256], index: 14, kind: output, shape index: {}]  }
   0x1   :  { %6329 = sst [smem:[#allocation7_spill]] %s6303_s0 }
   0x2   :  { %6330 = sst [smem:[#allocation8_spill]] %s6313_s10 }
   0x3   :  { %6331 = sst [smem:[#allocation9_spill]] %s6314_s11 }
   0x4   :  { %19 = vsyncpa [#allocation3], 0 }
   0x5   :  { %21 = vsyncpa [#allocation3 + $0x1], 0  ;;  %s5093_s29 = smov 0   ;;  %s5095_s30 = smov 0  }
   0x6   :  { %s5097_s15 = smov 0   ;;  %s5099_s16 = smov 0  }
   0x7 LB: > { %6332 = sst [smem:[#allocation5_spill]] %s5001_s15  ;;  %s5114_s17 = sadd.s32 4294967295, %s5005_s16   ;;  %s5005_s16 = sphi %s5099_s16, %s6354_s16   ;;  %s5001_s15 = sphi %s5097_s15, %s6351_s15   ;;  %s4997_s30 = sphi %s5095_s30, %s6353_s30   ;;  %s4993_s29 = sphi %s5093_s29, %s6352_s29  }
   0x8   : > { %s3579_s18 = sadd.s32 4294967294, %s5005_s16   ;;  %s5118_s19 = sadd.s32 1, %s5005_s16  }
   0x9   : > { %s333_s20 = sadd.s32 1, %s5001_s15  ;;  %s330_s21 = ssub.s32 %s5005_s16, %s5118_s19 }
   0xa   : > { %p343_p0 = scmp.ne.s32.totalorder %s5001_s15, %s4997_s30  ;;  %p331_p1 = scmp.eq.s32.totalorder %s330_s21, 0 }
   0xb   : > { %p344_p2 = scmp.eq.s32.totalorder %s5114_s17, 1  ;;  %p349_p3 = scmp.ne.s32.totalorder %s4997_s30, %s4993_s29 }
   0xc   : > { %p350_p4 = scmp.eq.s32.totalorder %s3579_s18, 1  ;;  %p3582_p7 = scmp.ge.s32.totalorder %s5005_s16, 1 }
   0xd   : > { %s5129_s22 = scalar_select %p331_p1, %s5001_s15, %s333_s20  }
   0xe   : > { %p5131_p5 = por %p344_p2, %p343_p0  ;;  %p5135_p6 = por %p350_p4, %p349_p3 }
   0xf   : > { %6333 = sst [smem:[#allocation6_spill]] %s5129_s22  ;;  %p414_p8 = scmp.lt.s32.totalorder %s5005_s16, 3 }
  0x11   : > { %p415_p9 = pnand %p3582_p7, %p414_p8 }
  0x12   : > { %p459_p10 = scmp.lt.s32.totalorder (!%p415_p9), %s5114_s17, 1  ;;  %vm505_vm0 = vcmask (!%p415_p9), 523264   ;;  %v522_v0 = vld [vmem:[%s6305_s2] sm:$0xff] (!%p415_p9)  ;;  %v523_v1 = vld [vmem:[%s6305_s2 + $0x8] sm:$0xff] (!%p415_p9)  ;;  %v5007_v3 = vmov (!%p415_p9), 0.0|0.0   ;;  %v524_v5 = vld [vmem:[%s6305_s2 + $0x10] sm:$0xff] (!%p415_p9) }
  0x13   : > { %418 = sbr.rel (%p415_p9) target bundleno = 5711 (0x164f), region = 76  ;;  %vm5150_vm1 = vmpackc.low (!%p415_p9), %vm505_vm0, %vm505_vm0  ;;  %4480 = vmatprep.subr.bf16.mxu0 (!%p415_p9), %v5007_v3  ;;  %v4481_v4 = vpack.c.bf16 (!%p415_p9), %v523_v1, %v522_v0  ;;  %4512 = vmatprep.subr.bf16.mxu1 (!%p415_p9), %v5007_v3  ;;  %v525_v6 = vld [vmem:[%s6305_s2 + $0x18] sm:$0xff] (!%p415_p9)  ;;  %s6338_s0 = sld [smem:[#allocation7_spill]] (!%p415_p9)  ;;  %v526_v11 = vld [vmem:[%s6305_s2 + $0x20] sm:$0xff] (!%p415_p9)  ;;  %vm5008_vm2 = vmmov (!%p415_p9), 0   ;;  %v5009_v19 = vmov (!%p415_p9), 0.0  }
  0x14   : > { %v4485_v9 = vpack.c.bf16 (!%p415_p9), %v525_v6, %v524_v5  ;;  %v527_v12 = vld [vmem:[%s6305_s2 + $0x28] sm:$0xff] (!%p415_p9)  ;;  %v528_v14 = vld [vmem:[%s6305_s2 + $0x30] sm:$0xff] (!%p415_p9)  ;;  %v529_v15 = vld [vmem:[%s6305_s2 + $0x38] sm:$0xff] (!%p415_p9)  ;;  %4146 = vmatprep.mubr.msk.f32.mxu0 (!%p415_p9), %vm5008_vm2, %v5009_v19  ;;  %4181 = vmatprep.mubr.msk.f32.mxu1 (!%p415_p9), %vm5008_vm2, %v5009_v19  ;;  %s6341_s10 = sld [smem:[#allocation8_spill]] (!%p415_p9)  ;;  %s6342_s11 = sld [smem:[#allocation9_spill]] (!%p415_p9)  ;;  %vm819_vm5 = vcmask (!%p415_p9), 130048  }
  0x15   : > { %4483 = vmatpush3.bf16.xpose.msk.msra.mxu0 (!%p415_p9), %vm5150_vm1, %v4481_v4  ;;  %v4489_v13 = vpack.c.bf16 (!%p415_p9), %v527_v12, %v526_v11  ;;  %v4493_v16 = vpack.c.bf16 (!%p415_p9), %v529_v15, %v528_v14  ;;  %v530_v17 = vld [vmem:[%s6305_s2 + $0x40] sm:$0xff] (!%p415_p9)  ;;  %v531_v18 = vld [vmem:[%s6305_s2 + $0x48] sm:$0xff] (!%p415_p9)  ;;  %v532_v21 = vld [vmem:[%s6305_s2 + $0x50] sm:$0xff] (!%p415_p9)  ;;  %s6322_s27 = smov (!%p415_p9), 112   ;;  %s6321_s28 = smov (!%p415_p9), 64   ;;  %vm895_vm6 = vcmask (!%p415_p9), 64512  }
  0x16   : > { %4484 = vmatprep.subr.bf16.mxu0 (!%p415_p9), %v5007_v3  ;;  %v4497_v20 = vpack.c.bf16 (!%p415_p9), %v531_v18, %v530_v17  ;;  %v533_v22 = vld [vmem:[%s6305_s2 + $0x58] sm:$0xff] (!%p415_p9)  ;;  %v465_v24 = vld [vmem:[%s6315_s12] sm:$0xff] (!%p415_p9)  ;;  %v466_v25 = vld [vmem:[%s6315_s12 + $0x8] sm:$0xff] (!%p415_p9)  ;;  %s6319_s21 = smov (!%p415_p9), 80   ;;  %s6327_s22 = smov (!%p415_p9), 16   ;;  %vm1480_vm7 = vcmask (!%p415_p9), 261120  }
  0x17   : > { %v4501_v23 = vpack.c.bf16 (!%p415_p9), %v533_v22, %v532_v21  ;;  %v467_v26 = vld [vmem:[%s6315_s12 + $0x10] sm:$0xff] (!%p415_p9)  ;;  %v534_v27 = vld [vmem:[%s6305_s2 + $0x60] sm:$0xff] (!%p415_p9)  ;;  %v535_v28 = vld [vmem:[%s6305_s2 + $0x68] sm:$0xff] (!%p415_p9)  ;;  %v5232_v29 = vpack.c.bf16 (!%p415_p9), %v466_v25, %v465_v24  ;;  %v497_v21 = vlaneseq (!%p415_p9)  ;;  %vm1482_vm8 = vcmask (!%p415_p9), 392192   ;;  %s6349_s25 = smov (!%p415_p9), 32   ;;  %s3841_s26 = sshll.u32 (!%p415_p9), %s5114_s17, 8 }
  0x18   : > { %v468_v30 = vld [vmem:[%s6315_s12 + $0x18] sm:$0xff] (!%p415_p9)  ;;  %v4505_v32 = vpack.c.bf16 (!%p415_p9), %v535_v28, %v534_v27  ;;  %v469_v33 = vld [vmem:[%s6315_s12 + $0x20] sm:$0xff] (!%p415_p9)  ;;  %v470_v34 = vld [vmem:[%s6315_s12 + $0x28] sm:$0xff] (!%p415_p9) }
  0x19   : > { %4514 = vmatpush3.bf16.msra.mxu1 (!%p415_p9), %v5232_v29  ;;  %v5238_v31 = vpack.c.bf16 (!%p415_p9), %v468_v30, %v467_v26  ;;  %v5248_v35 = vpack.c.bf16 (!%p415_p9), %v470_v34, %v469_v33  ;;  %v471_v36 = vld [vmem:[%s6315_s12 + $0x30] sm:$0xff] (!%p415_p9)  ;;  %v472_v37 = vld [vmem:[%s6315_s12 + $0x38] sm:$0xff] (!%p415_p9)  ;;  %v473_v42 = vld [vmem:[%s6315_s12 + $0x40] sm:$0xff] (!%p415_p9)  ;;  %v498_v25 = vshrl.u32 (!%p415_p9), %v497_v21, 7  ;;  %v5388_v26 = vand.u32 (!%p415_p9), 127, %v497_v21 }
  0x1a   : > { %s460_s18 = scalar_select %p459_p10, %s5114_s17, 1  ;;  %4515 = vmatprep.subr.bf16.mxu1 %v5007_v3  ;;  %v536_v38 = vld [vmem:[%s6305_s2 + $0x70] sm:$0xff]  ;;  %v537_v39 = vld [vmem:[%s6305_s2 + $0x78] sm:$0xff]  ;;  %v5267_v40 = vpack.c.bf16 %v472_v37, %v471_v36  ;;  %v474_v43 = vld [vmem:[%s6315_s12 + $0x48] sm:$0xff] }
  0x1b   : > { %v4509_v41 = vpack.c.bf16 %v537_v39, %v536_v38  ;;  %v5277_v44 = vpack.c.bf16 %v474_v43, %v473_v42  ;;  %v475_v45 = vld [vmem:[%s6315_s12 + $0x50] sm:$0xff]  ;;  %v476_v46 = vld [vmem:[%s6315_s12 + $0x58] sm:$0xff]  ;;  %v477_v48 = vld [vmem:[%s6315_s12 + $0x60] sm:$0xff]  ;;  %vm5391_vm3 = vcmp.le.s32.totalorder %v5388_v26, %v498_v25  ;;  %vm502_vm4 = vcmp.lt.s32.totalorder %v5388_v26, 96  ;;  %s5017_s17 = smov [#allocation2]  }
  0x1c   : > { %s3584_s20 = sshll.u32 %s460_s18, 3  ;;  %v5290_v47 = vpack.c.bf16 %v476_v46, %v475_v45  ;;  %v478_v49 = vld [vmem:[%s6315_s12 + $0x68] sm:$0xff]  ;;  %v3585_v55 = vld [vmem:[%s6304_s1] ss:$0 sm:$0xff]  ;;  %v479_v58 = vld [vmem:[%s6315_s12 + $0x70] sm:$0xff]  ;;  %s6320_s18 = smov 96  }
  0x1d   : > { %s462_s15 = scalar_lea.vmem %s6338_s0, %s3584_s20  ;;  %4487 = vmatpush3.bf16.xpose.msk.msra.mxu0 %vm5150_vm1, %v4485_v9  ;;  %4517 = vmatpush3.bf16.msra.mxu1 %v5238_v31  ;;  %v5300_v50 = vpack.c.bf16 %v478_v49, %v477_v48  ;;  %v480_v59 = vld [vmem:[%s6315_s12 + $0x78] sm:$0xff]  ;;  %v481_v61 = vld [vmem:[%s6316_s13] sm:$0xff]  ;;  %v482_v62 = vld [vmem:[%s6316_s13 + $0x8] sm:$0xff]  ;;  %s6323_s0 = smov 48  }
  0x1e   : > { %v5169_v7 = vld [vmem:[%s462_s15] sm:$0xff]  ;;  %4488 = vmatprep.subr.bf16.mxu0 %v5007_v3  ;;  %4518 = vmatprep.subr.bf16.mxu1 %v5007_v3  ;;  %v5318_v60 = vpack.c.bf16 %v480_v59, %v479_v58  ;;  %v5328_v0 = vpack.c.bf16 %v482_v62, %v481_v61  ;;  %v483_v5 = vld [vmem:[%s6316_s13 + $0x10] sm:$0xff]  ;;  %v484_v6 = vld [vmem:[%s6316_s13 + $0x18] sm:$0xff]  ;;  %s6325_s20 = smov 32   ;;  %s6347_s15 = smov 80  }
  0x1f   : > { %v504_v8 = vmul.f32 %v5169_v7, %v5169_v7  ;;  %v485_v9 = vld [vmem:[%s6316_s13 + $0x20] sm:$0xff]  ;;  %v487_v12 = vld [vmem:[%s6316_s13 + $0x30] sm:$0xff]  ;;  %v494_v24 = vld [vmem:[%s6316_s13 + $0x68] sm:$0xff] }
  0x20   : > { %v489_v15 = vld [vmem:[%s6316_s13 + $0x40] sm:$0xff]  ;;  %v491_v18 = vld [vmem:[%s6316_s13 + $0x50] sm:$0xff] }
  0x21   : > { %v506_v10 = vsel %vm505_vm0, %v504_v8, 0.0  ;;  %4520 = vmatpush3.bf16.msra.mxu1 %v5248_v35  ;;  %v5337_v8 = vpack.c.bf16 %v484_v6, %v483_v5  ;;  %v495_v30 = vld [vmem:[%s6316_s13 + $0x70] sm:$0xff]  ;;  %v5422_v45 = vld [vmem:[%s6341_s10] sm:$0xff] }
  0x22   : > { %507 = vadd.xlane.f32.xlu0 %v506_v10  ;;  %4521 = vmatprep.subr.bf16.mxu1 %v5007_v3  ;;  %v486_v10 = vld [vmem:[%s6316_s13 + $0x28] sm:$0xff]  ;;  %v5427_v46 = vld [vmem:[%s6342_s11] sm:$0xff] }
  0x23   : > { %v5349_v11 = vpack.c.bf16 %v486_v10, %v485_v9 }
  0x25   : > { %4491 = vmatpush3.bf16.xpose.msk.msra.mxu0 %vm5150_vm1, %v4489_v13  ;;  %4523 = vmatpush3.bf16.msra.mxu1 %v5267_v40  ;;  %v488_v13 = vld [vmem:[%s6316_s13 + $0x38] sm:$0xff] }
  0x26   : > { %4492 = vmatprep.subr.bf16.mxu0 %v5007_v3  ;;  %4524 = vmatprep.subr.bf16.mxu1 %v5007_v3  ;;  %v5360_v14 = vpack.c.bf16 %v488_v13, %v487_v12 }
  0x29   : > { %4526 = vmatpush3.bf16.msra.mxu1 %v5277_v44 }
  0x2a   : > { %4527 = vmatprep.subr.bf16.mxu1 %v5007_v3 }
  0x2d   : > { %4495 = vmatpush3.bf16.xpose.msk.msra.mxu0 %vm5150_vm1, %v4493_v16  ;;  %4529 = vmatpush3.bf16.msra.mxu1 %v5290_v47  ;;  %v490_v16 = vld [vmem:[%s6316_s13 + $0x48] sm:$0xff] }
  0x2e   : > { %4496 = vmatprep.subr.bf16.mxu0 %v5007_v3  ;;  %4530 = vmatprep.subr.bf16.mxu1 %v5007_v3  ;;  %v5370_v17 = vpack.c.bf16 %v490_v16, %v489_v15 }
  0x31   : > { %4532 = vmatpush3.bf16.msra.mxu1 %v5300_v50 }
  0x32   : > { %4533 = vmatprep.subr.bf16.mxu1 %v5007_v3 }
  0x35   : > { %4499 = vmatpush3.bf16.xpose.msk.msra.mxu0 %vm5150_vm1, %v4497_v20  ;;  %4535 = vmatpush3.bf16.msra.mxu1 %v5318_v60  ;;  %v492_v20 = vld [vmem:[%s6316_s13 + $0x58] sm:$0xff] }
  0x36   : > { %4500 = vmatprep.subr.bf16.mxu0 %v5007_v3  ;;  %4536 = vmatprep.subr.bf16.mxu1 %v5007_v3  ;;  %v5379_v22 = vpack.c.bf16 %v492_v20, %v491_v18 }
  0x3d   : > { %4503 = vmatpush3.bf16.xpose.msk.msra.mxu0 %vm5150_vm1, %v4501_v23  ;;  %v493_v23 = vld [vmem:[%s6316_s13 + $0x60] sm:$0xff] }
  0x3e   : > { %4504 = vmatprep.subr.bf16.mxu0 %v5007_v3  ;;  %v5396_v28 = vpack.c.bf16 %v494_v24, %v493_v23 }
  0x45   : > { %4507 = vmatpush3.bf16.xpose.msk.msra.mxu0 %vm5150_vm1, %v4505_v32  ;;  %v496_v32 = vld [vmem:[%s6316_s13 + $0x78] sm:$0xff] }
  0x46   : > { %4508 = vmatprep.subr.bf16.mxu0 %v5007_v3  ;;  %v5406_v33 = vpack.c.bf16 %v496_v32, %v495_v30 }
  0x4d   : > { %4511 = vmatpush3.bf16.xpose.msk.msra.mxu0 %vm5150_vm1, %v4509_v41  ;;  %v3603_v41 = vld [vmem:[%s6306_s3] ss:$0 sm:$0xff] }
  0x4e   : > { %4219 = vmatprep.subr.mxu0 %v5009_v19 }
  0xaf   : > { %v508_v51 = vpop.xlane.xlu0 %507 }
  0xb0   : > { %v510_v52 = vmul.f32 0.015625, %v508_v51 }
  0xb2   : > { %v511_v53 = vadd.f32 1e-06, %v510_v52 }
  0xb4   : > { %4889 = vrsqrt.f32 %v511_v53 }
  0xbe   : > { %v4890_v54 = vpop.eup %4889 }
  0xbf   : > { %v513_v56 = vmul.f32 %v4890_v54, %v5169_v7 }
  0xc1   : > { %v521_v57 = vmul.f32 %v3585_v55, %v513_v56 }
  0xc3   : > { %4147 = vmatmul.mubr.msk.f32.vlgmr.msra.gmra.mrb[0].mxu0 %vm505_vm0, %v521_v57 }
  0xc4   : > { %4221 = vmatprep.mubr.msk.f32.mxu0 %vm5008_vm2, %v5009_v19 }
 0x196   : > { %v655_v63 = vpop.f32.mrb[0].mxu0 }
 0x197   : > { %v659_v1 = vmul.f32 %v655_v63, %v655_v63  ;;  %v4148_v4 = vpop.f32.mrb[1].mxu0 }
 0x199   : > { %4182 = vmatmul.mubr.f32.vlgmr.msra.gmra.mrb[0].mxu1 %v659_v1 }
 0x19a   : > { %4538 = vmatpush3.bf16.msra.mxu1 %v5328_v0  ;;  %4216 = vmatprep.mubr.msk.f32.mxu1 %vm5008_vm2, %v5009_v19 }
 0x19b   : > { %4539 = vmatprep.subr.bf16.mxu1 %v5007_v3 }
 0x19e   : > { %4541 = vmatpush3.bf16.msra.mxu1 %v5337_v8 }
 0x19f   : > { %4542 = vmatprep.subr.bf16.mxu1 %v5007_v3 }
 0x1a2   : > { %4544 = vmatpush3.bf16.msra.mxu1 %v5349_v11 }
 0x1a3   : > { %4545 = vmatprep.subr.bf16.mxu1 %v5007_v3 }
 0x1a6   : > { %4547 = vmatpush3.bf16.msra.mxu1 %v5360_v14 }
 0x1a7   : > { %4548 = vmatprep.subr.bf16.mxu1 %v5007_v3 }
 0x1aa   : > { %4550 = vmatpush3.bf16.msra.mxu1 %v5370_v17 }
 0x1ab   : > { %4551 = vmatprep.subr.bf16.mxu1 %v5007_v3 }
 0x1ae   : > { %4553 = vmatpush3.bf16.msra.mxu1 %v5379_v22 }
 0x1af   : > { %4554 = vmatprep.subr.bf16.mxu1 %v5007_v3 }
 0x1b2   : > { %4556 = vmatpush3.bf16.msra.mxu1 %v5396_v28 }
 0x1b3   : > { %4557 = vmatprep.subr.bf16.mxu1 %v5007_v3 }
 0x1b6   : > { %4559 = vmatpush3.bf16.msra.mxu1 %v5406_v33 }
 0x1b7   : > { %4224 = vmatprep.subr.mxu1 %v5009_v19 }
 0x26c   : > { %v726_v34 = vpop.f32.mrb[0].mxu1 }
 0x26d   : > { %v727_v36 = vadd.f32 1e-06, %v726_v34  ;;  %v4183_v37 = vpop.f32.mrb[1].mxu1 }
 0x26f   : > { %4891 = vrsqrt.f32 %v727_v36 }
 0x279   : > { %v4892_v38 = vpop.eup %4891 }
 0x27a   : > { %v733_v39 = vsel %vm502_vm4, %v4892_v38, 1.0 }
 0x27b   : > { %v734_v42 = vmul.f32 %v733_v39, %v655_v63 }
 0x27d   : > { %v742_v43 = vmul.f32 %v3603_v41, %v734_v42 }
 0x27f   : > { %4217 = vmatmul.mubr.f32.vlgmr.msra.gmra.mrb[2].mxu1 %v742_v43  ;;  %v813_v49 = vmul.f32 %v742_v43, %v5422_v45 }
 0x280   : > { %4226 = vmatprep.mubr.msk.f32.mxu1 %vm5008_vm2, %v5009_v19 }
 0x352   : > { %v809_v48 = vpop.f32.mrb[2].mxu1 }
 0x353   : > { %v814_v51 = vmul.f32 %v809_v48, %v5427_v46  ;;  %v4218_v52 = vpop.f32.mrb[3].mxu1 }
 0x355   : > { %v5431_v53 = vadd.f32 %v814_v51, %v813_v49 }
 0x357   : > { %983 = vrot.lane.b32.xlu1 %v5431_v53, %s6322_s27  ;;  %817 = vrot.lane.b32.xlu0 %v5431_v53, %s6321_s28  ;;  %s6344_s28 = smov 112  }
 0x35b   : > { %1144 = vrot.lane.b32.xlu1 %v5431_v53, %s6323_s0  ;;  %s6345_s0 = smov 64  }
 0x35f   : > { %1142 = vrot.lane.b32.xlu1 %v5431_v53, %s6320_s18  ;;  %s6346_s18 = smov 96  }
 0x363   : > { %1308 = vrot.lane.b32.xlu1 %v5431_v53, %s6319_s21  ;;  %s6343_s21 = smov 48  }
 0x3c9   : > { %v984_v54 = vpop.permute.xlu1 %983  ;;  %v818_v55 = vpop.permute.xlu0 %817 }
 0x3ca   : > { %4220 = vmatpush3.xpose.msk.msra.mxu0 %vm819_vm5, %v818_v55 }
 0x3cb   : > { %4229 = vmatprep.subr.mxu0 %v5009_v19 }
 0x3cd   : > { %v1145_v56 = vpop.permute.xlu1 %1144  ;;  %4222 = vmatmul.mubr.msk.f32.vlgmr.msra.gmra.mrb[2].mxu0 %vm819_vm5, %v5431_v53 }
 0x3ce   : > { %4230 = vmatpush3.xpose.msk.msra.mxu0 %vm819_vm5, %v818_v55  ;;  %4231 = vmatprep.mubr.msk.f32.mxu0 %vm5008_vm2, %v5009_v19 }
 0x3cf   : > { %4239 = vmatprep.subr.mxu0 %v5009_v19 }
 0x3d1   : > { %4232 = vmatmul.mubr.msk.f32.vlgmr.msra.gmra.mrb[4].mxu0 %vm819_vm5, %v984_v54  ;;  %v1143_v57 = vpop.permute.xlu1 %1142 }
 0x3d2   : > { %4240 = vmatpush3.xpose.msk.msra.mxu0 %vm819_vm5, %v1145_v56  ;;  %4241 = vmatprep.mubr.msk.f32.mxu0 %vm5008_vm2, %v5009_v19 }
 0x3d3   : > { %4249 = vmatprep.subr.mxu0 %v5009_v19 }
 0x3d5   : > { %4242 = vmatmul.mubr.msk.f32.vlgmr.msra.gmra.mrb[6].mxu0 %vm819_vm5, %v1143_v57  ;;  %v1309_v58 = vpop.permute.xlu1 %1308 }
 0x3d6   : > { %4250 = vmatpush3.xpose.msk.msra.mxu0 %vm819_vm5, %v1145_v56  ;;  %4251 = vmatprep.mubr.msk.f32.mxu0 %vm5008_vm2, %v5009_v19 }
 0x3d7   : > { %4624 = vmatprep.subr.bf16.mxu0 %v5007_v3 }
 0x3d9   : > { %4252 = vmatmul.mubr.msk.f32.vlgmr.msra.gmra.mrb[8].mxu0 %vm819_vm5, %v1309_v58 }
 0x3da   : > { %4294 = vmatprep.mubr.msk.f32.mxu0 %vm5008_vm2, %v5009_v19 }
 0x4a0   : > { %v890_v59 = vpop.f32.mrb[2].mxu0 }
 0x4a1   : > { %v894_v61 = vsel %vm5391_vm3, %v890_v59, -inf  ;;  %v4223_v62 = vpop.f32.mrb[3].mxu0 }
 0x4a2   : > { %v896_v63 = vsel %vm895_vm6, %v894_v61, -inf }
 0x4a3   : > { %897 = vmax.xlane.f32.xlu1 %v896_v63 }
 0x4a4   : > { %v1053_v1 = vpop.f32.mrb[4].mxu0 }
 0x4a5   : > { %v1057_v4 = vsel %vm5391_vm3, %v1053_v1, -inf  ;;  %v4233_v5 = vpop.f32.mrb[5].mxu0 }
 0x4a6   : > { %v1058_v6 = vsel %vm895_vm6, %v1057_v4, -inf }
 0x4a7   : > { %1059 = vmax.xlane.f32.xlu0 %v1058_v6 }
 0x4a8   : > { %v1216_v9 = vpop.f32.mrb[6].mxu0 }
 0x4a9   : > { %v1220_v10 = vsel %vm5391_vm3, %v1216_v9, -inf  ;;  %v4243_v12 = vpop.f32.mrb[7].mxu0 }
 0x4aa   : > { %v1221_v13 = vsel %vm895_vm6, %v1220_v10, -inf  ;;  %v1484_v12 = vld [vmem:[%s6307_s4] sm:$0xff] }
 0x4ab   : > { %1222 = vmax.xlane.f32.xlu1 %v1221_v13  ;;  %v1485_v13 = vld [vmem:[%s6307_s4 + $0x8] sm:$0xff] }
 0x4ac   : > { %v1378_v15 = vpop.f32.mrb[8].mxu0 }
 0x4ad   : > { %v1382_v16 = vsel %vm5391_vm3, %v1378_v15, -inf  ;;  %v4253_v18 = vpop.f32.mrb[9].mxu0  ;;  %v4561_v15 = vpack.c.bf16 %v1485_v13, %v1484_v12  ;;  %v1610_v13 = vld [vmem:[%s6309_s6 + $0x20] sm:$0xff] }
 0x4ae   : > { %v1383_v20 = vsel %vm895_vm6, %v1382_v16, -inf  ;;  %v1487_v18 = vld [vmem:[%s6307_s4 + $0x18] sm:$0xff] }
 0x4af   : > { %1384 = vmax.xlane.f32.xlu1 %v1383_v20 }
 0x530   : > { %v898_v21 = vpop.xlane.xlu1 %897 }
 0x531   : > { %v899_v23 = vsub.f32 %v894_v61, %v898_v21  ;;  %v1488_v21 = vld [vmem:[%s6307_s4 + $0x20] sm:$0xff] }
 0x533   : > { %v900_v24 = vmul.f32 1.442695, %v899_v23  ;;  %v1489_v23 = vld [vmem:[%s6307_s4 + $0x28] sm:$0xff] }
 0x534   : > { %v1060_v25 = vpop.xlane.xlu0 %1059 }
 0x535   : > { %4893 = vpow2.f32 %v900_v24  ;;  %v1061_v30 = vsub.f32 %v1057_v4, %v1060_v25  ;;  %v4569_v24 = vpack.c.bf16 %v1489_v23, %v1488_v21  ;;  %v1490_v25 = vld [vmem:[%s6307_s4 + $0x30] sm:$0xff] }
 0x536   : > { %v1612_v23 = vld [vmem:[%s6309_s6 + $0x30] sm:$0xff] }
 0x537   : > { %v1062_v32 = vmul.f32 1.442695, %v1061_v30  ;;  %v1491_v30 = vld [vmem:[%s6307_s4 + $0x38] sm:$0xff] }
 0x538   : > { %v1223_v34 = vpop.xlane.xlu1 %1222 }
 0x539   : > { %4895 = vpow2.f32 %v1062_v32  ;;  %v1224_v36 = vsub.f32 %v1220_v10, %v1223_v34  ;;  %v4573_v32 = vpack.c.bf16 %v1491_v30, %v1490_v25  ;;  %v1630_v25 = vld [vmem:[%s6309_s6 + $0xc0] sm:$0xff]  ;;  %v1631_v30 = vld [vmem:[%s6309_s6 + $0xc8] sm:$0xff] }
 0x53b   : > { %v1225_v37 = vmul.f32 1.442695, %v1224_v36 }
 0x53c   : > { %v1385_v38 = vpop.xlane.xlu1 %1384 }
 0x53d   : > { %4897 = vpow2.f32 %v1225_v37  ;;  %v1386_v39 = vsub.f32 %v1382_v16, %v1385_v38  ;;  %v1486_v16 = vld [vmem:[%s6307_s4 + $0x10] sm:$0xff] }
 0x53e   : > { %v4565_v20 = vpack.c.bf16 %v1487_v18, %v1486_v16  ;;  %v1628_v16 = vld [vmem:[%s6309_s6 + $0xb0] sm:$0xff]  ;;  %v1629_v18 = vld [vmem:[%s6309_s6 + $0xb8] sm:$0xff] }
 0x53f   : > { %v4894_v41 = vpop.eup %4893  ;;  %v1387_v42 = vmul.f32 1.442695, %v1386_v39  ;;  %v4594_v21 = vpack.c.bf16 %v1629_v18, %v1628_v16 }
 0x540   : > { %v902_v43 = vsel %vm895_vm6, %v4894_v41, 0.0 }
 0x541   : > { %4899 = vpow2.f32 %v1387_v42  ;;  %903 = vadd.xlane.f32.xlu0 %v902_v43 }
 0x543   : > { %v4896_v48 = vpop.eup %4895 }
 0x544   : > { %v1064_v49 = vsel %vm895_vm6, %v4896_v48, 0.0 }
 0x545   : > { %1065 = vadd.xlane.f32.xlu1 %v1064_v49 }
 0x547   : > { %v4898_v51 = vpop.eup %4897 }
 0x548   : > { %v1227_v52 = vsel %vm895_vm6, %v4898_v51, 0.0 }
 0x549   : > { %1228 = vadd.xlane.f32.xlu0 %v1227_v52 }
 0x54b   : > { %v4900_v54 = vpop.eup %4899 }
 0x54c   : > { %v1389_v55 = vsel %vm895_vm6, %v4900_v54, 0.0 }
 0x54d   : > { %1390 = vadd.xlane.f32.xlu1 %v1389_v55 }
 0x55e   : > { %1232 = vrot.lane.b32.xlu1 %v5431_v53, %s6327_s22 }
 0x55f   : > { %907 = vrot.lane.b32.xlu0 %v5431_v53, %s6325_s20 }
 0x5ce   : > { %v904_v56 = vpop.xlane.xlu0 %903 }
 0x5cf   : > { %4901 = vrcp.f32 %v904_v56  ;;  %v1622_v56 = vld [vmem:[%s6309_s6 + $0x80] sm:$0xff] }
 0x5d2   : > { %v1066_v57 = vpop.xlane.xlu1 %1065 }
 0x5d3   : > { %4903 = vrcp.f32 %v1066_v57  ;;  %v1623_v57 = vld [vmem:[%s6309_s6 + $0x88] sm:$0xff] }
 0x5d6   : > { %v1229_v58 = vpop.xlane.xlu0 %1228 }
 0x5d7   : > { %4905 = vrcp.f32 %v1229_v58  ;;  %v1606_v58 = vld [vmem:[%s6309_s6] sm:$0xff] }
 0x5d9   : > { %v4902_v59 = vpop.eup %4901 }
 0x5da   : > { %v906_v61 = vmul.f32 %v4902_v59, %v4894_v41  ;;  %v908_v62 = vpop.permute.xlu0 %907  ;;  %v1391_v63 = vpop.xlane.xlu1 %1390  ;;  %v4576_v59 = vpack.c.bf16 %v1623_v57, %v1622_v56  ;;  %v1634_v57 = vld [vmem:[%s6309_s6 + $0xe0] sm:$0xff] }
 0x5db   : > { %4907 = vrcp.f32 %v1391_v63  ;;  %4225 = vmatpush3.msra.mxu1 %v908_v62  ;;  %v1625_v63 = vld [vmem:[%s6309_s6 + $0x98] sm:$0xff] }
 0x5dc   : > { %4227 = vmatmul.mubr.msk.f32.vlgmr.msra.gmra.mrb[4].mxu1 %vm895_vm6, %v906_v61  ;;  %4234 = vmatprep.subr.mxu1 %v5009_v19  ;;  %v1607_v61 = vld [vmem:[%s6309_s6 + $0x8] sm:$0xff] }
 0x5dd   : > { %v4904_v1 = vpop.eup %4903  ;;  %4235 = vmatpush3.msra.mxu1 %v908_v62  ;;  %4236 = vmatprep.mubr.msk.f32.mxu1 %vm5008_vm2, %v5009_v19  ;;  %v1624_v62 = vld [vmem:[%s6309_s6 + $0x90] sm:$0xff] }
 0x5de   : > { %v1068_v53 = vmul.f32 %v4904_v1, %v4896_v48  ;;  %v1233_v4 = vpop.permute.xlu1 %1232  ;;  %4244 = vmatprep.subr.mxu1 %v5009_v19  ;;  %v4579_v1 = vpack.c.bf16 %v1607_v61, %v1606_v58  ;;  %v1635_v58 = vld [vmem:[%s6309_s6 + $0xe8] sm:$0xff] }
 0x5df   : > { %v1619_v61 = vld [vmem:[%s6309_s6 + $0x68] sm:$0xff] }
 0x5e0   : > { %4237 = vmatmul.mubr.msk.f32.vlgmr.msra.gmra.mrb[6].mxu1 %vm895_vm6, %v1068_v53  ;;  %v4582_v53 = vpack.c.bf16 %v1625_v63, %v1624_v62  ;;  %v1636_v63 = vld [vmem:[%s6309_s6 + $0xf0] sm:$0xff] }
 0x5e1   : > { %v4906_v5 = vpop.eup %4905  ;;  %4245 = vmatpush3.msra.mxu1 %v1233_v4  ;;  %4246 = vmatprep.mubr.msk.f32.mxu1 %vm5008_vm2, %v5009_v19 }
 0x5e2   : > { %v1231_v6 = vmul.f32 %v4906_v5, %v4898_v51  ;;  %4254 = vmatprep.subr.mxu1 %v5009_v19  ;;  %v1609_v5 = vld [vmem:[%s6309_s6 + $0x18] sm:$0xff] }
 0x5e4   : > { %4247 = vmatmul.mubr.msk.f32.vlgmr.msra.gmra.mrb[8].mxu1 %vm895_vm6, %v1231_v6  ;;  %v1626_v6 = vld [vmem:[%s6309_s6 + $0xa0] sm:$0xff] }
 0x5e5   : > { %v4908_v9 = vpop.eup %4907  ;;  %4255 = vmatpush3.msra.mxu1 %v1233_v4  ;;  %4256 = vmatprep.mubr.msk.f32.mxu1 %vm5008_vm2, %v5009_v19  ;;  %v1608_v4 = vld [vmem:[%s6309_s6 + $0x10] sm:$0xff] }
 0x5e6   : > { %v1393_v10 = vmul.f32 %v4908_v9, %v4900_v54  ;;  %4560 = vmatprep.subr.bf16.mxu1 %v5007_v3  ;;  %v1627_v9 = vld [vmem:[%s6309_s6 + $0xa8] sm:$0xff] }
 0x5e7   : > { %v4588_v12 = vpack.c.bf16 %v1627_v9, %v1626_v6 }
 0x5e8   : > { %4257 = vmatmul.mubr.msk.f32.vlgmr.msra.gmra.mrb[10].mxu1 %vm895_vm6, %v1393_v10  ;;  %v4585_v10 = vpack.c.bf16 %v1609_v5, %v1608_v4  ;;  %v1620_v4 = vld [vmem:[%s6309_s6 + $0x70] sm:$0xff]  ;;  %v1621_v5 = vld [vmem:[%s6309_s6 + $0x78] sm:$0xff] }
 0x5e9   : > { %4275 = vmatprep.mubr.msk.f32.mxu1 %vm5008_vm2, %v5009_v19  ;;  %v4621_v6 = vpack.c.bf16 %v1621_v5, %v1620_v4 }
 0x5ec   : > { %4563 = vmatpush3.bf16.xpose.msk.msra.mxu1 %vm5150_vm1, %v4561_v15  ;;  %v1611_v15 = vld [vmem:[%s6309_s6 + $0x28] sm:$0xff] }
 0x5ed   : > { %4564 = vmatprep.subr.bf16.mxu1 %v5007_v3 }
 0x5f4   : > { %4567 = vmatpush3.bf16.xpose.msk.msra.mxu1 %vm5150_vm1, %v4565_v20  ;;  %v4591_v20 = vpack.c.bf16 %v1611_v15, %v1610_v13  ;;  %v3625_v15 = vld [vmem:[%s6308_s5] ss:$0 sm:$0xff] }
 0x5f5   : > { %4568 = vmatprep.subr.bf16.mxu1 %v5007_v3 }
 0x5fc   : > { %4571 = vmatpush3.bf16.xpose.msk.msra.mxu1 %vm5150_vm1, %v4569_v24  ;;  %v1613_v24 = vld [vmem:[%s6309_s6 + $0x38] sm:$0xff] }
 0x5fd   : > { %4572 = vmatprep.subr.bf16.mxu1 %v5007_v3 }
 0x604   : > { %4575 = vmatpush3.bf16.xpose.msk.msra.mxu1 %vm5150_vm1, %v4573_v32  ;;  %v4597_v32 = vpack.c.bf16 %v1613_v24, %v1612_v23  ;;  %v1823_v23 = vld [vmem:[%s6310_s7 + $0x38] sm:$0xff] }
 0x605   : > { %4578 = vmatprep.subr.msk.bf16.mxu1 %vm5150_vm1, %v4576_v59  ;;  %v4612_v59 = vpack.c.bf16 %v1635_v58, %v1634_v57  ;;  %v3668_v57 = vld [vmem:[%s6305_s2 + $0xb0] sm:$0xff]  ;;  %v3669_v58 = vld [vmem:[%s6305_s2 + $0xb8] sm:$0xff] }
 0x6af   : > { %v979_v34 = vpop.f32.mrb[4].mxu1 }
 0x6b0   : > { %v4228_v36 = vpop.f32.mrb[5].mxu1 }
 0x6b1   : > { %v1614_v36 = vld [vmem:[%s6309_s6 + $0x40] sm:$0xff] }
 0x6b3   : > { %v1138_v37 = vpop.f32.mrb[6].mxu1 }
 0x6b4   : > { %1468 = vrot.lane.b32.xlu1 %v1138_v37, %s6327_s22  ;;  %v4238_v38 = vpop.f32.mrb[7].mxu1  ;;  %v1615_v37 = vld [vmem:[%s6309_s6 + $0x48] sm:$0xff] }
 0x6b5   : > { %v1632_v38 = vld [vmem:[%s6309_s6 + $0xd0] sm:$0xff] }
 0x6b7   : > { %v1304_v39 = vpop.f32.mrb[8].mxu1 }
 0x6b8   : > { %1472 = vrot.lane.b32.xlu0 %v1304_v39, %s6325_s20  ;;  %v4248_v41 = vpop.f32.mrb[9].mxu1  ;;  %v1633_v39 = vld [vmem:[%s6309_s6 + $0xd8] sm:$0xff]  ;;  %s6348_s20 = smov 16  }
 0x6b9   : > { %v4603_v41 = vpack.c.bf16 %v1615_v37, %v1614_v36 }
 0x6bb   : > { %v1463_v42 = vpop.f32.mrb[10].mxu1 }
 0x6bc   : > { %1476 = vrot.lane.b32.xlu1 %v1463_v42, %s6343_s21  ;;  %v4258_v43 = vpop.f32.mrb[11].mxu1  ;;  %v4606_v42 = vpack.c.bf16 %v1633_v39, %v1632_v38 }
 0x6bd   : > { %v1616_v43 = vld [vmem:[%s6309_s6 + $0x50] sm:$0xff] }
 0x726   : > { %v1469_v48 = vpop.permute.xlu1 %1468 }
 0x727   : > { %v1479_v51 = vsel %vm819_vm5, %v979_v34, %v1469_v48  ;;  %v4600_v34 = vpack.c.bf16 %v1631_v30, %v1630_v25  ;;  %v1617_v48 = vld [vmem:[%s6309_s6 + $0x58] sm:$0xff] }
 0x72a   : > { %v1473_v49 = vpop.permute.xlu0 %1472 }
 0x72b   : > { %v1481_v52 = vsel %vm1480_vm7, %v1479_v51, %v1473_v49  ;;  %v4609_v49 = vpack.c.bf16 %v1617_v48, %v1616_v43  ;;  %v3664_v48 = vld [vmem:[%s6305_s2 + $0x90] sm:$0xff] }
 0x72e   : > { %v1477_v54 = vpop.permute.xlu1 %1476 }
 0x72f   : > { %v1483_v55 = vsel %vm1482_vm8, %v1481_v52, %v1477_v54 }
 0x730   : > { %4276 = vmatmul.mubr.msk.f32.vlgmr.msra.gmra.mrb[12].mxu1 %vm505_vm0, %v1483_v55 }
 0x731   : > { %4581 = vmatpush3.bf16.xpose.msk.msra.mxu1 %vm5150_vm1, %v4579_v1  ;;  %v1637_v1 = vld [vmem:[%s6309_s6 + $0xf8] sm:$0xff] }
 0x732   : > { %4584 = vmatprep.subr.msk.bf16.mxu1 %vm5150_vm1, %v4582_v53  ;;  %v4618_v53 = vpack.c.bf16 %v1637_v1, %v1636_v63  ;;  %v3672_v63 = vld [vmem:[%s6305_s2 + $0xd0] sm:$0xff]  ;;  %v3673_v1 = vld [vmem:[%s6305_s2 + $0xd8] sm:$0xff] }
 0x739   : > { %4587 = vmatpush3.bf16.xpose.msk.msra.mxu1 %vm5150_vm1, %v4585_v10 }
 0x73a   : > { %4590 = vmatprep.subr.msk.bf16.mxu1 %vm5150_vm1, %v4588_v12 }
 0x741   : > { %4593 = vmatpush3.bf16.xpose.msk.msra.mxu1 %vm5150_vm1, %v4591_v20 }
 0x742   : > { %4596 = vmatprep.subr.msk.bf16.mxu1 %vm5150_vm1, %v4594_v21  ;;  %v1822_v21 = vld [vmem:[%s6310_s7 + $0x30] sm:$0xff] }
 0x743   : > { %v4634_v24 = vpack.c.bf16 %v1823_v23, %v1822_v21 }
 0x749   : > { %4599 = vmatpush3.bf16.xpose.msk.msra.mxu1 %vm5150_vm1, %v4597_v32 }
 0x74a   : > { %4602 = vmatprep.subr.msk.bf16.mxu1 %vm5150_vm1, %v4600_v34 }
 0x751   : > { %4605 = vmatpush3.bf16.xpose.msk.msra.mxu1 %vm5150_vm1, %v4603_v41  ;;  %v3662_v41 = vld [vmem:[%s6305_s2 + $0x80] sm:$0xff] }
 0x752   : > { %4608 = vmatprep.subr.msk.bf16.mxu1 %vm5150_vm1, %v4606_v42  ;;  %v3663_v42 = vld [vmem:[%s6305_s2 + $0x88] sm:$0xff] }
 0x753   : > { %v4637_v43 = vpack.c.bf16 %v3663_v42, %v3662_v41 }
 0x759   : > { %4611 = vmatpush3.bf16.xpose.msk.msra.mxu1 %vm5150_vm1, %v4609_v49  ;;  %v3665_v49 = vld [vmem:[%s6305_s2 + $0x98] sm:$0xff] }
 0x75a   : > { %4614 = vmatprep.subr.msk.bf16.mxu1 %vm5150_vm1, %v4612_v59  ;;  %v4649_v59 = vpack.c.bf16 %v3669_v58, %v3668_v57 }
 0x803   : > { %v1585_v51 = vpop.f32.mrb[12].mxu1 }
 0x804   : > { %v5639_v52 = vadd.f32 %v1585_v51, %v5169_v7  ;;  %v4277_v54 = vpop.f32.mrb[13].mxu1  ;;  %v1618_v7 = vld [vmem:[%s6309_s6 + $0x60] sm:$0xff]  ;;  %v4641_v51 = vpack.c.bf16 %v3665_v49, %v3664_v48 }
 0x805   : > { %v4615_v62 = vpack.c.bf16 %v1619_v61, %v1618_v7  ;;  %v3666_v54 = vld [vmem:[%s6305_s2 + $0xa0] sm:$0xff]  ;;  %v3671_v61 = vld [vmem:[%s6305_s2 + $0xc8] sm:$0xff] }
 0x806   : > { %v1590_v55 = vmul.f32 %v5639_v52, %v5639_v52  ;;  %v3670_v7 = vld [vmem:[%s6305_s2 + $0xc0] sm:$0xff] }
 0x807   : > { %4617 = vmatpush3.bf16.xpose.msk.msra.mxu1 %vm5150_vm1, %v4615_v62  ;;  %v4653_v62 = vpack.c.bf16 %v3671_v61, %v3670_v7 }
 0x808   : > { %v1591_v56 = vsel %vm505_vm0, %v1590_v55, 0.0  ;;  %4620 = vmatprep.subr.msk.bf16.mxu1 %vm5150_vm1, %v4618_v53  ;;  %v3667_v55 = vld [vmem:[%s6305_s2 + $0xa8] sm:$0xff]  ;;  %v4657_v53 = vpack.c.bf16 %v3673_v1, %v3672_v63 }
 0x809   : > { %1592 = vadd.xlane.f32.xlu0 %v1591_v56  ;;  %v4645_v56 = vpack.c.bf16 %v3667_v55, %v3666_v54 }
 0x80f   : > { %4623 = vmatpush3.bf16.xpose.msk.msra.mxu1 %vm5150_vm1, %v4621_v6 }
 0x810   : > { %4668 = vmatprep.subr.bf16.mxu1 %v5007_v3 }
 0x896   : > { %v1593_v9 = vpop.xlane.xlu0 %1592 }
 0x897   : > { %v1594_v10 = vmul.f32 0.015625, %v1593_v9 }
 0x899   : > { %v1595_v12 = vadd.f32 1e-06, %v1594_v10 }
 0x89b   : > { %4909 = vrsqrt.f32 %v1595_v12  ;;  %v3674_v12 = vld [vmem:[%s6305_s2 + $0xe0] sm:$0xff] }
 0x8a5   : > { %v4910_v13 = vpop.eup %4909 }
 0x8a6   : > { %v1597_v16 = vmul.f32 %v4910_v13, %v5639_v52  ;;  %v3675_v13 = vld [vmem:[%s6305_s2 + $0xe8] sm:$0xff] }
 0x8a8   : > { %v1605_v18 = vmul.f32 %v3625_v15, %v1597_v16  ;;  %v4661_v15 = vpack.c.bf16 %v3675_v13, %v3674_v12  ;;  %v3677_v16 = vld [vmem:[%s6305_s2 + $0xf8] sm:$0xff] }
 0x8aa   : > { %3950 = vmatprep.mubr.msk.f32.mxu1 %vm505_vm0, %v1605_v18 }
 0x8ab   : > { %3951 = vmatmul.mubr.msk.f32.vlgmr.msra.gmra.mrb[14].mxu1 %vm505_vm0, %v1605_v18 }
 0x8ac   : > { %4670 = vmatpush3.bf16.msra.mxu1 %v5232_v29  ;;  %4364 = vmatprep.mubr.msk.f32.mxu1 %vm5008_vm2, %v5009_v19  ;;  %v1816_v29 = vld [vmem:[%s6310_s7] sm:$0xff] }
 0x8ad   : > { %4671 = vmatprep.subr.bf16.mxu1 %v5007_v3 }
 0x8b0   : > { %4673 = vmatpush3.bf16.msra.mxu1 %v5238_v31  ;;  %v1817_v31 = vld [vmem:[%s6310_s7 + $0x8] sm:$0xff] }
 0x8b1   : > { %4674 = vmatprep.subr.bf16.mxu1 %v5007_v3 }
 0x8b4   : > { %4676 = vmatpush3.bf16.msra.mxu1 %v5248_v35  ;;  %v4625_v35 = vpack.c.bf16 %v1817_v31, %v1816_v29 }
 0x8b5   : > { %4677 = vmatprep.subr.bf16.mxu1 %v5007_v3 }
 0x8b6   : > { %4626 = vmatpush3.bf16.xpose.msra.mxu0 %v4625_v35 }
 0x8b7   : > { %4627 = vmatprep.subr.bf16.mxu0 %v5007_v3 }
 0x8b8   : > { %4679 = vmatpush3.bf16.msra.mxu1 %v5267_v40  ;;  %v1818_v40 = vld [vmem:[%s6310_s7 + $0x10] sm:$0xff] }
 0x8b9   : > { %4680 = vmatprep.subr.bf16.mxu1 %v5007_v3 }
 0x8bc   : > { %4682 = vmatpush3.bf16.msra.mxu1 %v5277_v44  ;;  %v1819_v44 = vld [vmem:[%s6310_s7 + $0x18] sm:$0xff] }
 0x8bd   : > { %4683 = vmatprep.subr.bf16.mxu1 %v5007_v3 }
 0x8c0   : > { %4685 = vmatpush3.bf16.msra.mxu1 %v5290_v47  ;;  %v4628_v47 = vpack.c.bf16 %v1819_v44, %v1818_v40  ;;  %v3661_v44 = vld [vmem:[%s6304_s1 + $0x1] ss:$0 sm:$0xff] }
 0x8c1   : > { %4686 = vmatprep.subr.bf16.mxu1 %v5007_v3 }
 0x8c2   : > { %4629 = vmatpush3.bf16.xpose.msra.mxu0 %v4628_v47 }
 0x8c3   : > { %4630 = vmatprep.subr.bf16.mxu0 %v5007_v3 }
 0x8c4   : > { %4688 = vmatpush3.bf16.msra.mxu1 %v5300_v50  ;;  %v1820_v50 = vld [vmem:[%s6310_s7 + $0x20] sm:$0xff] }
 0x8c5   : > { %4689 = vmatprep.subr.bf16.mxu1 %v5007_v3 }
 0x8c8   : > { %4691 = vmatpush3.bf16.msra.mxu1 %v5318_v60  ;;  %v1821_v60 = vld [vmem:[%s6310_s7 + $0x28] sm:$0xff] }
 0x8c9   : > { %4692 = vmatprep.subr.bf16.mxu1 %v5007_v3  ;;  %v4631_v20 = vpack.c.bf16 %v1821_v60, %v1820_v50 }
 0x8cb   : > { %4632 = vmatpush3.bf16.xpose.msra.mxu0 %v4631_v20 }
 0x8cc   : > { %4633 = vmatprep.subr.bf16.mxu0 %v5007_v3 }
 0x8d3   : > { %4635 = vmatpush3.bf16.xpose.msra.mxu0 %v4634_v24 }
 0x8d4   : > { %4636 = vmatprep.subr.bf16.mxu0 %v5007_v3 }
 0x97e   : > { %v1803_v25 = vpop.f32.mrb[14].mxu1 }
 0x97f   : > { %v3659_v30 = vmul.f32 -1.442695, %v1803_v25  ;;  %v1805_v32 = vpop.f32.mrb[15].mxu1 }
 0x981   : > { %4911 = vpow2.f32 %v3659_v30 }
 0x98b   : > { %v4912_v34 = vpop.eup %4911 }
 0x98c   : > { %v1811_v36 = vadd.f32 1.0, %v4912_v34 }
 0x98e   : > { %4913 = vrcp.f32 %v1811_v36 }
 0x998   : > { %v4914_v37 = vpop.eup %4913 }
 0x999   : > { %v1814_v38 = vmul.f32 %v4914_v37, %v1803_v25 }
 0x99b   : > { %v1815_v39 = vmul.f32 %v1814_v38, %v1805_v32 }
 0x99d   : > { %4295 = vmatmul.mubr.f32.vlgmr.msra.gmra.mrb[10].mxu0 %v1815_v39 }
 0x99e   : > { %4329 = vmatprep.mubr.msk.f32.mxu0 %vm5008_vm2, %v5009_v19  ;;  %4639 = vmatpush3.bf16.xpose.msk.msra.mxu0 %vm5150_vm1, %v4637_v43 }
 0x99f   : > { %4640 = vmatprep.subr.bf16.mxu0 %v5007_v3 }
 0x9a6   : > { %4643 = vmatpush3.bf16.xpose.msk.msra.mxu0 %vm5150_vm1, %v4641_v51 }
 0x9a7   : > { %4644 = vmatprep.subr.bf16.mxu0 %v5007_v3 }
 0x9ae   : > { %4647 = vmatpush3.bf16.xpose.msk.msra.mxu0 %vm5150_vm1, %v4645_v56 }
 0x9af   : > { %4648 = vmatprep.subr.bf16.mxu0 %v5007_v3 }
 0x9b6   : > { %4651 = vmatpush3.bf16.xpose.msk.msra.mxu0 %vm5150_vm1, %v4649_v59 }
 0x9b7   : > { %4652 = vmatprep.subr.bf16.mxu0 %v5007_v3 }
 0x9be   : > { %4655 = vmatpush3.bf16.xpose.msk.msra.mxu0 %vm5150_vm1, %v4653_v62 }
 0x9bf   : > { %4656 = vmatprep.subr.bf16.mxu0 %v5007_v3 }
 0x9c6   : > { %4659 = vmatpush3.bf16.xpose.msk.msra.mxu0 %vm5150_vm1, %v4657_v53 }
 0x9c7   : > { %4660 = vmatprep.subr.bf16.mxu0 %v5007_v3 }
 0x9ce   : > { %4663 = vmatpush3.bf16.xpose.msk.msra.mxu0 %vm5150_vm1, %v4661_v15 }
 0x9cf   : > { %4664 = vmatprep.subr.bf16.mxu0 %v5007_v3 }
 0xa70   : > { %v1890_v4 = vpop.f32.mrb[10].mxu0 }
 0xa71   : > { %v5786_v5 = vadd.f32 %v1890_v4, %v5639_v52  ;;  %v4296_v6 = vpop.f32.mrb[11].mxu0  ;;  %v3676_v52 = vld [vmem:[%s6305_s2 + $0xf0] sm:$0xff] }
 0xa72   : > { %v4665_v18 = vpack.c.bf16 %v3677_v16, %v3676_v52 }
 0xa73   : > { %v1895_v9 = vmul.f32 %v5786_v5, %v5786_v5 }
 0xa74   : > { %4667 = vmatpush3.bf16.xpose.msk.msra.mxu0 %vm5150_vm1, %v4665_v18 }
 0xa75   : > { %v1896_v10 = vsel %vm505_vm0, %v1895_v9, 0.0  ;;  %4402 = vmatprep.subr.mxu0 %v5009_v19 }
 0xa76   : > { %1897 = vadd.xlane.f32.xlu1 %v1896_v10 }
 0xb03   : > { %v1898_v29 = vpop.xlane.xlu1 %1897 }
 0xb04   : > { %v1899_v31 = vmul.f32 0.015625, %v1898_v29 }
 0xb06   : > { %v1900_v35 = vadd.f32 1e-06, %v1899_v31 }
 0xb08   : > { %4915 = vrsqrt.f32 %v1900_v35 }
 0xb12   : > { %v4916_v40 = vpop.eup %4915 }
 0xb13   : > { %v1902_v47 = vmul.f32 %v4916_v40, %v5786_v5 }
 0xb15   : > { %v1911_v50 = vmul.f32 %v3661_v44, %v1902_v47 }
 0xb17   : > { %4330 = vmatmul.mubr.msk.f32.vlgmr.msra.gmra.mrb[12].mxu0 %vm505_vm0, %v1911_v50 }
 0xb18   : > { %4404 = vmatprep.mubr.msk.f32.mxu0 %vm5008_vm2, %v5009_v19 }
 0xbea   : > { %v2046_v60 = vpop.f32.mrb[12].mxu0 }
 0xbeb   : > { %v2050_v20 = vmul.f32 %v2046_v60, %v2046_v60  ;;  %v4331_v21 = vpop.f32.mrb[13].mxu0 }
 0xbed   : > { %4365 = vmatmul.mubr.f32.vlgmr.msra.gmra.mrb[16].mxu1 %v2050_v20 }
 0xbee   : > { %4694 = vmatpush3.bf16.msra.mxu1 %v5328_v0  ;;  %4399 = vmatprep.mubr.msk.f32.mxu1 %vm5008_vm2, %v5009_v19 }
 0xbef   : > { %4695 = vmatprep.subr.bf16.mxu1 %v5007_v3 }
 0xbf2   : > { %4697 = vmatpush3.bf16.msra.mxu1 %v5337_v8 }
 0xbf3   : > { %4698 = vmatprep.subr.bf16.mxu1 %v5007_v3 }
 0xbf6   : > { %4700 = vmatpush3.bf16.msra.mxu1 %v5349_v11 }
 0xbf7   : > { %4701 = vmatprep.subr.bf16.mxu1 %v5007_v3 }
 0xbfa   : > { %4703 = vmatpush3.bf16.msra.mxu1 %v5360_v14 }
 0xbfb   : > { %4704 = vmatprep.subr.bf16.mxu1 %v5007_v3 }
 0xbfe   : > { %4706 = vmatpush3.bf16.msra.mxu1 %v5370_v17 }
 0xbff   : > { %4707 = vmatprep.subr.bf16.mxu1 %v5007_v3 }
 0xc02   : > { %4709 = vmatpush3.bf16.msra.mxu1 %v5379_v22  ;;  %v3696_v22 = vld [vmem:[%s6306_s3 + $0x1] ss:$0 sm:$0xff] }
 0xc03   : > { %4710 = vmatprep.subr.bf16.mxu1 %v5007_v3 }
 0xc06   : > { %4712 = vmatpush3.bf16.msra.mxu1 %v5396_v28 }
 0xc07   : > { %4713 = vmatprep.subr.bf16.mxu1 %v5007_v3 }
 0xc0a   : > { %4715 = vmatpush3.bf16.msra.mxu1 %v5406_v33 }
 0xc0b   : > { %4407 = vmatprep.subr.mxu1 %v5009_v19 }
 0xcc0   : > { %v2117_v0 = vpop.f32.mrb[16].mxu1 }
 0xcc1   : > { %v2118_v8 = vadd.f32 1e-06, %v2117_v0  ;;  %v4366_v11 = vpop.f32.mrb[17].mxu1 }
 0xcc3   : > { %4917 = vrsqrt.f32 %v2118_v8 }
 0xccd   : > { %v4918_v14 = vpop.eup %4917 }
 0xcce   : > { %v2122_v17 = vsel %vm502_vm4, %v4918_v14, 1.0 }
 0xccf   : > { %v2123_v23 = vmul.f32 %v2122_v17, %v2046_v60 }
 0xcd1   : > { %v2132_v28 = vmul.f32 %v3696_v22, %v2123_v23 }
 0xcd3   : > { %4400 = vmatmul.mubr.f32.vlgmr.msra.gmra.mrb[18].mxu1 %v2132_v28  ;;  %v2203_v24 = vmul.f32 %v2132_v28, %v5422_v45 }
 0xcd4   : > { %4409 = vmatprep.mubr.msk.f32.mxu1 %vm5008_vm2, %v5009_v19 }
 0xda6   : > { %v2199_v33 = vpop.f32.mrb[18].mxu1 }
 0xda7   : > { %v2204_v25 = vmul.f32 %v2199_v33, %v5427_v46  ;;  %v4401_v30 = vpop.f32.mrb[19].mxu1  ;;  %v3709_v33 = vld [vmem:[%s6307_s4 + $0x40] sm:$0xff] }
 0xda8   : > { %v3711_v30 = vld [vmem:[%s6307_s4 + $0x50] sm:$0xff] }
 0xda9   : > { %v5843_v32 = vadd.f32 %v2204_v25, %v2203_v24  ;;  %v3710_v24 = vld [vmem:[%s6307_s4 + $0x48] sm:$0xff] }
 0xdaa   : > { %v4717_v25 = vpack.c.bf16 %v3710_v24, %v3709_v33 }
 0xdab   : > { %2371 = vrot.lane.b32.xlu1 %v5843_v32, %s6344_s28  ;;  %2207 = vrot.lane.b32.xlu0 %v5843_v32, %s6345_s0  ;;  %s6263_s0 = scalar_lea.hbm %s6317_s14, %s3841_s26 }
 0xdaf   : > { %2530 = vrot.lane.b32.xlu1 %v5843_v32, %s6346_s18  ;;  %2532 = vrot.lane.b32.xlu0 %v5843_v32, %s6343_s21 }
 0xdb3   : > { %2696 = vrot.lane.b32.xlu0 %v5843_v32, %s6347_s15  ;;  %s456_s15 = sand.u32 1, %s4997_s30  }
 0xdb4   : > { %s3583_s10 = sshll.u32 %s456_s15, 4 }
 0xdb5   : > { %s458_s22 = scalar_lea.vmem [#allocation2], %s3583_s10 }
 0xdb6   : > { %s3520_s11 = sshll.u32 %s458_s22, 4  ;;  %s6258_s11 = int_to_ptr.vmem [resolvable:$true] %s3520_s11 }
 0xe1d   : > { %v2208_v26 = vpop.permute.xlu0 %2207  ;;  %v2372_v45 = vpop.permute.xlu1 %2371 }
 0xe1e   : > { %4403 = vmatpush3.xpose.msk.msra.mxu0 %vm819_vm5, %v2208_v26 }
 0xe1f   : > { %4412 = vmatprep.subr.mxu0 %v5009_v19 }
 0xe21   : > { %4405 = vmatmul.mubr.msk.f32.vlgmr.msra.gmra.mrb[14].mxu0 %vm819_vm5, %v5843_v32  ;;  %v2533_v46 = vpop.permute.xlu0 %2532  ;;  %v2531_v34 = vpop.permute.xlu1 %2530 }
 0xe22   : > { %4413 = vmatpush3.xpose.msk.msra.mxu0 %vm819_vm5, %v2208_v26  ;;  %4414 = vmatprep.mubr.msk.f32.mxu0 %vm5008_vm2, %v5009_v19 }
 0xe23   : > { %4422 = vmatprep.subr.mxu0 %v5009_v19 }
 0xe25   : > { %4415 = vmatmul.mubr.msk.f32.vlgmr.msra.gmra.mrb[16].mxu0 %vm819_vm5, %v2372_v45  ;;  %v2697_v36 = vpop.permute.xlu0 %2696  ;;  %v3713_v45 = vld [vmem:[%s6307_s4 + $0x60] sm:$0xff] }
 0xe26   : > { %4423 = vmatpush3.xpose.msk.msra.mxu0 %vm819_vm5, %v2533_v46  ;;  %4424 = vmatprep.mubr.msk.f32.mxu0 %vm5008_vm2, %v5009_v19 }
 0xe27   : > { %4432 = vmatprep.subr.mxu0 %v5009_v19 }
 0xe29   : > { %4425 = vmatmul.mubr.msk.f32.vlgmr.msra.gmra.mrb[18].mxu0 %vm819_vm5, %v2531_v34 }
 0xe2a   : > { %4433 = vmatpush3.xpose.msk.msra.mxu0 %vm819_vm5, %v2533_v46  ;;  %4434 = vmatprep.mubr.msk.f32.mxu0 %vm5008_vm2, %v5009_v19  ;;  %v3714_v46 = vld [vmem:[%s6307_s4 + $0x68] sm:$0xff] }
 0xe2b   : > { %4716 = vmatprep.subr.bf16.mxu0 %v5007_v3  ;;  %v4725_v34 = vpack.c.bf16 %v3714_v46, %v3713_v45  ;;  %v3756_v45 = vld [vmem:[%s6309_s6 + $0x1e0] sm:$0xff]  ;;  %v3757_v46 = vld [vmem:[%s6309_s6 + $0x1e8] sm:$0xff] }
 0xe2d   : > { %4435 = vmatmul.mubr.msk.f32.vlgmr.msra.gmra.mrb[20].mxu0 %vm819_vm5, %v2697_v36  ;;  %v3715_v36 = vld [vmem:[%s6307_s4 + $0x70] sm:$0xff] }
 0xe2e   : > { %4458 = vmatprep.mubr.msk.f32.mxu0 %vm5008_vm2, %v5009_v19  ;;  %4719 = vmatpush3.bf16.xpose.msk.msra.mxu0 %vm5150_vm1, %v4717_v25 }
 0xe2f   : > { %4720 = vmatprep.subr.bf16.mxu0 %v5007_v3 }
 0xef4   : > { %v2279_v37 = vpop.f32.mrb[14].mxu0 }
 0xef5   : > { %v2283_v38 = vsel %vm5391_vm3, %v2279_v37, -inf  ;;  %v4406_v39 = vpop.f32.mrb[15].mxu0  ;;  %v3716_v37 = vld [vmem:[%s6307_s4 + $0x78] sm:$0xff] }
 0xef6   : > { %v2284_v41 = vsel %vm895_vm6, %v2283_v38, -inf }
 0xef7   : > { %2285 = vmax.xlane.f32.xlu1 %v2284_v41 }
 0xef8   : > { %v2441_v42 = vpop.f32.mrb[16].mxu0 }
 0xef9   : > { %v2445_v43 = vsel %vm5391_vm3, %v2441_v42, -inf  ;;  %v4416_v48 = vpop.f32.mrb[17].mxu0 }
 0xefa   : > { %v2446_v49 = vsel %vm895_vm6, %v2445_v43, -inf }
 0xefb   : > { %2447 = vmax.xlane.f32.xlu0 %v2446_v49 }
 0xefc   : > { %v2604_v51 = vpop.f32.mrb[18].mxu0 }
 0xefd   : > { %v2608_v54 = vsel %vm5391_vm3, %v2604_v51, -inf  ;;  %v4426_v55 = vpop.f32.mrb[19].mxu0 }
 0xefe   : > { %v2609_v56 = vsel %vm895_vm6, %v2608_v54, -inf }
 0xeff   : > { %2610 = vmax.xlane.f32.xlu0 %v2609_v56 }
 0xf00   : > { %v2766_v57 = vpop.f32.mrb[20].mxu0 }
 0xf01   : > { %v2770_v58 = vsel %vm5391_vm3, %v2766_v57, -inf  ;;  %v4436_v59 = vpop.f32.mrb[21].mxu0 }
 0xf02   : > { %v2771_v7 = vsel %vm895_vm6, %v2770_v58, -inf }
 0xf03   : > { %2772 = vmax.xlane.f32.xlu1 %v2771_v7 }
 0xf84   : > { %v2286_v61 = vpop.xlane.xlu1 %2285 }
 0xf85   : > { %v2287_v62 = vsub.f32 %v2283_v38, %v2286_v61  ;;  %v4729_v38 = vpack.c.bf16 %v3716_v37, %v3715_v36  ;;  %v3744_v61 = vld [vmem:[%s6309_s6 + $0x180] sm:$0xff]  ;;  %v3741_v36 = vld [vmem:[%s6309_s6 + $0x168] sm:$0xff] }
 0xf87   : > { %v2288_v63 = vmul.f32 1.442695, %v2287_v62  ;;  %v3745_v62 = vld [vmem:[%s6309_s6 + $0x188] sm:$0xff] }
 0xf88   : > { %v2448_v1 = vpop.xlane.xlu0 %2447 }
 0xf89   : > { %4919 = vpow2.f32 %v2288_v63  ;;  %v2449_v53 = vsub.f32 %v2445_v43, %v2448_v1  ;;  %v3728_v63 = vld [vmem:[%s6309_s6 + $0x100] sm:$0xff]  ;;  %v4732_v1 = vpack.c.bf16 %v3745_v62, %v3744_v61  ;;  %v3796_v62 = vld [vmem:[%s6310_s7 + $0x50] sm:$0xff] }
 0xf8b   : > { %v2450_v4 = vmul.f32 1.442695, %v2449_v53  ;;  %v3729_v53 = vld [vmem:[%s6309_s6 + $0x108] sm:$0xff] }
 0xf8c   : > { %v2611_v6 = vpop.xlane.xlu0 %2610 }
 0xf8d   : > { %4921 = vpow2.f32 %v2450_v4  ;;  %v2612_v9 = vsub.f32 %v2608_v54, %v2611_v6  ;;  %v3747_v4 = vld [vmem:[%s6309_s6 + $0x198] sm:$0xff]  ;;  %v4735_v6 = vpack.c.bf16 %v3729_v53, %v3728_v63  ;;  %v3798_v53 = vld [vmem:[%s6310_s7 + $0x60] sm:$0xff] }
 0xf8e   : > { %v3797_v63 = vld [vmem:[%s6310_s7 + $0x58] sm:$0xff] }
 0xf8f   : > { %v2613_v10 = vmul.f32 1.442695, %v2612_v9 }
 0xf90   : > { %v2773_v12 = vpop.xlane.xlu1 %2772 }
 0xf91   : > { %4923 = vpow2.f32 %v2613_v10  ;;  %v2774_v13 = vsub.f32 %v2770_v58, %v2773_v12  ;;  %v3730_v10 = vld [vmem:[%s6309_s6 + $0x110] sm:$0xff]  ;;  %v3731_v12 = vld [vmem:[%s6309_s6 + $0x118] sm:$0xff] }
 0xf93   : > { %v4920_v27 = vpop.eup %4919  ;;  %v2775_v15 = vmul.f32 1.442695, %v2774_v13  ;;  %v3748_v13 = vld [vmem:[%s6309_s6 + $0x1a0] sm:$0xff] }
 0xf94   : > { %v2290_v52 = vsel %vm895_vm6, %v4920_v27, 0.0 }
 0xf95   : > { %4925 = vpow2.f32 %v2775_v15  ;;  %2291 = vadd.xlane.f32.xlu0 %v2290_v52  ;;  %v4741_v15 = vpack.c.bf16 %v3731_v12, %v3730_v10 }
 0xf97   : > { %v4922_v16 = vpop.eup %4921 }
 0xf98   : > { %v2452_v18 = vsel %vm895_vm6, %v4922_v16, 0.0 }
 0xf99   : > { %2453 = vadd.xlane.f32.xlu1 %v2452_v18  ;;  %v3733_v18 = vld [vmem:[%s6309_s6 + $0x128] sm:$0xff] }
 0xf9b   : > { %v4924_v29 = vpop.eup %4923 }
 0xf9c   : > { %v2615_v31 = vsel %vm895_vm6, %v4924_v29, 0.0 }
 0xf9d   : > { %2616 = vadd.xlane.f32.xlu0 %v2615_v31  ;;  %v3751_v31 = vld [vmem:[%s6309_s6 + $0x1b8] sm:$0xff] }
 0xf9f   : > { %v4926_v35 = vpop.eup %4925 }
 0xfa0   : > { %v2777_v40 = vsel %vm895_vm6, %v4926_v35, 0.0 }
 0xfa1   : > { %2778 = vadd.xlane.f32.xlu1 %v2777_v40 }
 0xfb2   : > { %2620 = vrot.lane.b32.xlu1 %v5843_v32, %s6348_s20 }
 0xfb3   : > { %2295 = vrot.lane.b32.xlu0 %v5843_v32, %s6349_s25  ;;  %v3712_v32 = vld [vmem:[%s6307_s4 + $0x58] sm:$0xff] }
 0xfb4   : > { %v4721_v26 = vpack.c.bf16 %v3712_v32, %v3711_v30 }
 0xfb6   : > { %4723 = vmatpush3.bf16.xpose.msk.msra.mxu0 %vm5150_vm1, %v4721_v26 }
 0xfb7   : > { %4724 = vmatprep.subr.bf16.mxu0 %v5007_v3 }
 0xfbe   : > { %4727 = vmatpush3.bf16.xpose.msk.msra.mxu0 %vm5150_vm1, %v4725_v34  ;;  %v4768_v34 = vpack.c.bf16 %v3757_v46, %v3756_v45  ;;  %v3325_v45 = vld [vmem:[%s6312_s9 + $0xc0] sm:$0xff]  ;;  %v3326_v46 = vld [vmem:[%s6312_s9 + $0xc8] sm:$0xff] }
 0xfbf   : > { %4728 = vmatprep.subr.bf16.mxu0 %v5007_v3 }
 0xfc6   : > { %4731 = vmatpush3.bf16.xpose.msk.msra.mxu0 %vm5150_vm1, %v4729_v38  ;;  %v3758_v38 = vld [vmem:[%s6309_s6 + $0x1f0] sm:$0xff] }
 0xfc7   : > { %4780 = vmatprep.subr.bf16.mxu0 %v5007_v3 }
0x1022   : > { %v2292_v44 = vpop.xlane.xlu0 %2291 }
0x1023   : > { %4927 = vrcp.f32 %v2292_v44  ;;  %v3734_v44 = vld [vmem:[%s6309_s6 + $0x130] sm:$0xff] }
0x1026   : > { %v2454_v47 = vpop.xlane.xlu1 %2453 }
0x1027   : > { %4929 = vrcp.f32 %v2454_v47  ;;  %v3735_v47 = vld [vmem:[%s6309_s6 + $0x138] sm:$0xff] }
0x102a   : > { %v2617_v50 = vpop.xlane.xlu0 %2616 }
0x102b   : > { %4931 = vrcp.f32 %v2617_v50  ;;  %v3752_v50 = vld [vmem:[%s6309_s6 + $0x1c0] sm:$0xff] }
0x102d   : > { %v4928_v60 = vpop.eup %4927 }
0x102e   : > { %v2294_v20 = vmul.f32 %v4928_v60, %v4920_v27  ;;  %v2296_v21 = vpop.permute.xlu0 %2295  ;;  %v2779_v0 = vpop.xlane.xlu1 %2778  ;;  %v3749_v27 = vld [vmem:[%s6309_s6 + $0x1a8] sm:$0xff] }
0x102f   : > { %4933 = vrcp.f32 %v2779_v0  ;;  %4408 = vmatpush3.msra.mxu1 %v2296_v21  ;;  %v4744_v52 = vpack.c.bf16 %v3749_v27, %v3748_v13  ;;  %v3753_v60 = vld [vmem:[%s6309_s6 + $0x1c8] sm:$0xff]  ;;  %v3736_v0 = vld [vmem:[%s6309_s6 + $0x140] sm:$0xff] }
0x1030   : > { %4410 = vmatmul.mubr.msk.f32.vlgmr.msra.gmra.mrb[20].mxu1 %vm895_vm6, %v2294_v20  ;;  %4417 = vmatprep.subr.mxu1 %v5009_v19  ;;  %v4753_v20 = vpack.c.bf16 %v3735_v47, %v3734_v44  ;;  %v3302_v44 = vld [vmem:[%s6312_s9 + $0x8] sm:$0xff]  ;;  %v3319_v47 = vld [vmem:[%s6312_s9 + $0x90] sm:$0xff] }
0x1031   : > { %v4930_v8 = vpop.eup %4929  ;;  %4418 = vmatpush3.msra.mxu1 %v2296_v21  ;;  %4419 = vmatprep.mubr.msk.f32.mxu1 %vm5008_vm2, %v5009_v19  ;;  %v4756_v21 = vpack.c.bf16 %v3753_v60, %v3752_v50  ;;  %v3320_v50 = vld [vmem:[%s6312_s9 + $0x98] sm:$0xff] }
0x1032   : > { %v2456_v11 = vmul.f32 %v4930_v8, %v4922_v16  ;;  %v2621_v14 = vpop.permute.xlu1 %2620  ;;  %4427 = vmatprep.subr.mxu1 %v5009_v19  ;;  %v3732_v16 = vld [vmem:[%s6309_s6 + $0x120] sm:$0xff]  ;;  %v3737_v8 = vld [vmem:[%s6309_s6 + $0x148] sm:$0xff] }
0x1034   : > { %4420 = vmatmul.mubr.msk.f32.vlgmr.msra.gmra.mrb[22].mxu1 %vm895_vm6, %v2456_v11  ;;  %v3754_v11 = vld [vmem:[%s6309_s6 + $0x1d0] sm:$0xff] }
0x1035   : > { %v4932_v17 = vpop.eup %4931  ;;  %4428 = vmatpush3.msra.mxu1 %v2621_v14  ;;  %4429 = vmatprep.mubr.msk.f32.mxu1 %vm5008_vm2, %v5009_v19 }
0x1036   : > { %v2619_v22 = vmul.f32 %v4932_v17, %v4924_v29  ;;  %4437 = vmatprep.subr.mxu1 %v5009_v19  ;;  %v3750_v29 = vld [vmem:[%s6309_s6 + $0x1b0] sm:$0xff]  ;;  %v4759_v17 = vpack.c.bf16 %v3737_v8, %v3736_v0  ;;  %v3304_v0 = vld [vmem:[%s6312_s9 + $0x18] sm:$0xff]  ;;  %v3321_v8 = vld [vmem:[%s6312_s9 + $0xa0] sm:$0xff] }
0x1037   : > { %v4750_v40 = vpack.c.bf16 %v3751_v31, %v3750_v29  ;;  %v3317_v29 = vld [vmem:[%s6312_s9 + $0x80] sm:$0xff]  ;;  %v3318_v31 = vld [vmem:[%s6312_s9 + $0x88] sm:$0xff] }
0x1038   : > { %4430 = vmatmul.mubr.msk.f32.vlgmr.msra.gmra.mrb[24].mxu1 %vm895_vm6, %v2619_v22 }
0x1039   : > { %v4934_v23 = vpop.eup %4933  ;;  %4438 = vmatpush3.msra.mxu1 %v2621_v14  ;;  %4439 = vmatprep.mubr.msk.f32.mxu1 %vm5008_vm2, %v5009_v19  ;;  %v3755_v14 = vld [vmem:[%s6309_s6 + $0x1d8] sm:$0xff] }
0x103a   : > { %v2781_v28 = vmul.f32 %v4934_v23, %v4926_v35  ;;  %4734 = vmatprep.subr.msk.bf16.mxu1 %vm5150_vm1, %v4732_v1  ;;  %v4747_v35 = vpack.c.bf16 %v3733_v18, %v3732_v16  ;;  %v4762_v22 = vpack.c.bf16 %v3755_v14, %v3754_v11  ;;  %v3738_v23 = vld [vmem:[%s6309_s6 + $0x150] sm:$0xff]  ;;  %v4784_v1 = vpack.c.bf16 %v3797_v63, %v3796_v62  ;;  %v3322_v11 = vld [vmem:[%s6312_s9 + $0xa8] sm:$0xff] }
0x103b   : > { %v3331_v63 = vld [vmem:[%s6312_s9 + $0xf0] sm:$0xff] }
0x103c   : > { %4440 = vmatmul.mubr.msk.f32.vlgmr.msra.gmra.mrb[26].mxu1 %vm895_vm6, %v2781_v28  ;;  %v3739_v28 = vld [vmem:[%s6309_s6 + $0x158] sm:$0xff] }
0x103d   : > { %v4765_v33 = vpack.c.bf16 %v3739_v28, %v3738_v23  ;;  %v3306_v23 = vld [vmem:[%s6312_s9 + $0x28] sm:$0xff]  ;;  %v3323_v28 = vld [vmem:[%s6312_s9 + $0xb0] sm:$0xff] }
0x1040   : > { %4737 = vmatpush3.bf16.xpose.msk.msra.mxu1 %vm5150_vm1, %v4735_v6  ;;  %v3800_v6 = vld [vmem:[%s6310_s7 + $0x70] sm:$0xff] }
0x1103   : > { %v2367_v39 = vpop.f32.mrb[20].mxu1 }
0x1104   : > { %v4411_v41 = vpop.f32.mrb[21].mxu1 }
0x1107   : > { %v2526_v42 = vpop.f32.mrb[22].mxu1 }
0x1108   : > { %2856 = vrot.lane.b32.xlu1 %v2526_v42, %s6348_s20  ;;  %v4421_v43 = vpop.f32.mrb[23].mxu1  ;;  %v3742_v42 = vld [vmem:[%s6309_s6 + $0x170] sm:$0xff]  ;;  %s3506_s20 = scalar_lea.sflag [#allocation3], %s456_s15 }
0x1109   : > { %v3743_v43 = vld [vmem:[%s6309_s6 + $0x178] sm:$0xff] }
0x110b   : > { %v2692_v48 = vpop.f32.mrb[24].mxu1 }
0x110c   : > { %2860 = vrot.lane.b32.xlu0 %v2692_v48, %s6349_s25  ;;  %v4431_v49 = vpop.f32.mrb[25].mxu1  ;;  %v4777_v48 = vpack.c.bf16 %v3743_v43, %v3742_v42  ;;  %v3311_v43 = vld [vmem:[%s6312_s9 + $0x50] sm:$0xff]  ;;  %s4943_s25 = scalar_lea.vmem %s6258_s11, 256 }
0x110d   : > { %p4944_p11 = scmp.ne.s32.totalorder %s6258_s11, %s4943_s25 }
0x110f   : > { %v2851_v51 = vpop.f32.mrb[26].mxu1  ;;  %p4945_p12 = pnand %p4944_p11, %p5131_p5 }
0x1110   : > { %2864 = vrot.lane.b32.xlu1 %v2851_v51, %s6343_s21  ;;  %v4441_v54 = vpop.f32.mrb[27].mxu1  ;;  %s4947_s21 = sshll.u32 %s5017_s17, 4  ;;  %s4948_s21 = int_to_ptr.vmem [resolvable:$false] %s4947_s21 }
0x1111   : > { %p4946_p13 = pneg %p4945_p12  ;;  %s4949_s18 = scalar_lea.vmem %s4948_s21, 512 }
0x1112   : > { %p4950_p0 = scmp.lt.s32.totalorder %s6258_s11, %s4948_s21  ;;  %p4951_p1 = scmp.lt.s32.totalorder %s4949_s18, %s4943_s25 }
0x1114   : > { %p4952_p2 = por %p4951_p1, %p4950_p0 }
0x1116   : > { %p4953_p3 = pnand %p4952_p2, %p4946_p13 }
0x117a   : > { %v2857_v55 = vpop.permute.xlu1 %2856 }
0x117b   : > { %v2867_v57 = vsel %vm819_vm5, %v2367_v39, %v2857_v55  ;;  %v3759_v39 = vld [vmem:[%s6309_s6 + $0x1f8] sm:$0xff] }
0x117c   : > { %v4774_v41 = vpack.c.bf16 %v3759_v39, %v3758_v38  ;;  %v3327_v38 = vld [vmem:[%s6312_s9 + $0xd0] sm:$0xff]  ;;  %v3328_v39 = vld [vmem:[%s6312_s9 + $0xd8] sm:$0xff] }
0x117d   : > { %v4822_v42 = vpack.c.bf16 %v3328_v39, %v3327_v38 }
0x117e   : > { %v2861_v56 = vpop.permute.xlu0 %2860 }
0x117f   : > { %v2868_v58 = vsel %vm1480_vm7, %v2867_v57, %v2861_v56  ;;  %v3727_v56 = vld [vmem:[%s6308_s5 + $0x1] ss:$0 sm:$0xff] }
0x1182   : > { %v2865_v59 = vpop.permute.xlu1 %2864 }
0x1183   : > { %v2869_v7 = vsel %vm1482_vm8, %v2868_v58, %v2865_v59  ;;  %v3794_v59 = vld [vmem:[%s6310_s7 + $0x40] sm:$0xff] }
0x1184   : > { %4459 = vmatmul.mubr.msk.f32.vlgmr.msra.gmra.mrb[22].mxu0 %vm505_vm0, %v2869_v7  ;;  %v3795_v7 = vld [vmem:[%s6310_s7 + $0x48] sm:$0xff] }
0x1185   : > { %4477 = vmatprep.mubr.msk.f32.mxu0 %vm5008_vm2, %v5009_v19  ;;  %v3746_v19 = vld [vmem:[%s6309_s6 + $0x190] sm:$0xff]  ;;  %v4781_v61 = vpack.c.bf16 %v3795_v7, %v3794_v59  ;;  %v3330_v59 = vld [vmem:[%s6312_s9 + $0xe8] sm:$0xff] }
0x1186   : > { %v4738_v9 = vpack.c.bf16 %v3747_v4, %v3746_v19  ;;  %v3799_v19 = vld [vmem:[%s6310_s7 + $0x68] sm:$0xff] }
0x1187   : > { %4782 = vmatpush3.bf16.xpose.msra.mxu0 %v4781_v61  ;;  %v4787_v4 = vpack.c.bf16 %v3799_v19, %v3798_v53  ;;  %v3313_v61 = vld [vmem:[%s6312_s9 + $0x60] sm:$0xff]  ;;  %v3315_v19 = vld [vmem:[%s6312_s9 + $0x70] sm:$0xff] }
0x1188   : > { %4740 = vmatprep.subr.msk.bf16.mxu1 %vm5150_vm1, %v4738_v9  ;;  %4783 = vmatprep.subr.bf16.mxu0 %v5007_v3  ;;  %v3801_v9 = vld [vmem:[%s6310_s7 + $0x78] sm:$0xff] }
0x1189   : > { %4743 = vmatpush3.bf16.xpose.msk.msra.mxu1 %vm5150_vm1, %v4741_v15  ;;  %v4790_v10 = vpack.c.bf16 %v3801_v9, %v3800_v6 }
0x118a   : > { %4746 = vmatprep.subr.msk.bf16.mxu1 %vm5150_vm1, %v4744_v52 }
0x118f   : > { %4785 = vmatpush3.bf16.xpose.msra.mxu0 %v4784_v1  ;;  %v3332_v1 = vld [vmem:[%s6312_s9 + $0xf8] sm:$0xff] }
0x1190   : > { %4786 = vmatprep.subr.bf16.mxu0 %v5007_v3  ;;  %v4834_v53 = vpack.c.bf16 %v3332_v1, %v3331_v63 }
0x1191   : > { %4749 = vmatpush3.bf16.xpose.msk.msra.mxu1 %vm5150_vm1, %v4747_v35  ;;  %v3301_v35 = vld [vmem:[%s6312_s9] sm:$0xff] }
0x1192   : > { %4752 = vmatprep.subr.msk.bf16.mxu1 %vm5150_vm1, %v4750_v40  ;;  %v4792_v40 = vpack.c.bf16 %v3318_v31, %v3317_v29  ;;  %v4795_v60 = vpack.c.bf16 %v3302_v44, %v3301_v35 }
0x1197   : > { %4788 = vmatpush3.bf16.xpose.msra.mxu0 %v4787_v4  ;;  %v3316_v4 = vld [vmem:[%s6312_s9 + $0x78] sm:$0xff] }
0x1198   : > { %4789 = vmatprep.subr.bf16.mxu0 %v5007_v3  ;;  %v4837_v6 = vpack.c.bf16 %v3316_v4, %v3315_v19 }
0x1199   : > { %4755 = vmatpush3.bf16.xpose.msk.msra.mxu1 %vm5150_vm1, %v4753_v20  ;;  %v4798_v20 = vpack.c.bf16 %v3320_v50, %v3319_v47 }
0x119a   : > { %4758 = vmatprep.subr.msk.bf16.mxu1 %vm5150_vm1, %v4756_v21  ;;  %v3303_v21 = vld [vmem:[%s6312_s9 + $0x10] sm:$0xff] }
0x119b   : > { %v4801_v14 = vpack.c.bf16 %v3304_v0, %v3303_v21 }
0x119f   : > { %4791 = vmatpush3.bf16.xpose.msra.mxu0 %v4790_v10 }
0x11a0   : > { %4794 = vmatprep.subr.msk.bf16.mxu0 %vm5150_vm1, %v4792_v40 }
0x11a1   : > { %4761 = vmatpush3.bf16.xpose.msk.msra.mxu1 %vm5150_vm1, %v4759_v17  ;;  %v4804_v17 = vpack.c.bf16 %v3322_v11, %v3321_v8 }
0x11a2   : > { %4764 = vmatprep.subr.msk.bf16.mxu1 %vm5150_vm1, %v4762_v22  ;;  %v3305_v22 = vld [vmem:[%s6312_s9 + $0x20] sm:$0xff] }
0x11a9   : > { %4767 = vmatpush3.bf16.xpose.msk.msra.mxu1 %vm5150_vm1, %v4765_v33  ;;  %v3324_v33 = vld [vmem:[%s6312_s9 + $0xb8] sm:$0xff] }
0x11aa   : > { %4770 = vmatprep.subr.msk.bf16.mxu1 %vm5150_vm1, %v4768_v34 }
0x1257   : > { %v2972_v24 = vpop.f32.mrb[22].mxu0 }
0x1258   : > { %v6051_v25 = vadd.f32 %v2972_v24, %v5786_v5  ;;  %v4460_v30 = vpop.f32.mrb[23].mxu0  ;;  %v3740_v5 = vld [vmem:[%s6309_s6 + $0x160] sm:$0xff]  ;;  %v4807_v24 = vpack.c.bf16 %v3306_v23, %v3305_v22 }
0x1259   : > { %v4771_v37 = vpack.c.bf16 %v3741_v36, %v3740_v5  ;;  %v4810_v30 = vpack.c.bf16 %v3324_v33, %v3323_v28  ;;  %v4816_v5 = vpack.c.bf16 %v3326_v46, %v3325_v45  ;;  %v3309_v36 = vld [vmem:[%s6312_s9 + $0x40] sm:$0xff] }
0x125a   : > { %v2977_v32 = vmul.f32 %v6051_v25, %v6051_v25 }
0x125b   : > { %4773 = vmatpush3.bf16.xpose.msk.msra.mxu1 %vm5150_vm1, %v4771_v37  ;;  %v3310_v37 = vld [vmem:[%s6312_s9 + $0x48] sm:$0xff] }
0x125c   : > { %v2978_v26 = vsel %vm505_vm0, %v2977_v32, 0.0  ;;  %4776 = vmatprep.subr.msk.bf16.mxu1 %vm5150_vm1, %v4774_v41  ;;  %v3307_v32 = vld [vmem:[%s6312_s9 + $0x30] sm:$0xff]  ;;  %v4819_v41 = vpack.c.bf16 %v3310_v37, %v3309_v36 }
0x125d   : > { %2979 = vadd.xlane.f32.xlu0 %v2978_v26  ;;  %v3308_v26 = vld [vmem:[%s6312_s9 + $0x38] sm:$0xff] }
0x125e   : > { %v4813_v34 = vpack.c.bf16 %v3308_v26, %v3307_v32 }
0x1263   : > { %4779 = vmatpush3.bf16.xpose.msk.msra.mxu1 %vm5150_vm1, %v4777_v48  ;;  %v3312_v48 = vld [vmem:[%s6312_s9 + $0x58] sm:$0xff] }
0x12ea   : > { %v2980_v49 = vpop.xlane.xlu0 %2979 }
0x12eb   : > { %v2981_v51 = vmul.f32 0.015625, %v2980_v49  ;;  %v4825_v49 = vpack.c.bf16 %v3312_v48, %v3311_v43 }
0x12ed   : > { %v2982_v54 = vadd.f32 1e-06, %v2981_v51 }
0x12ef   : > { %4935 = vrsqrt.f32 %v2982_v54 }
0x12f9   : > { %v4936_v55 = vpop.eup %4935 }
0x12fa   : > { %v2984_v57 = vmul.f32 %v4936_v55, %v6051_v25 }
0x12fc   : > { %v2993_v58 = vmul.f32 %v3727_v56, %v2984_v57 }
0x12fe   : > { %4069 = vmatprep.mubr.msk.f32.mxu1 %vm505_vm0, %v2993_v58 }
0x12ff   : > { %4070 = vmatmul.mubr.msk.f32.vlgmr.msra.gmra.mrb[28].mxu1 %vm505_vm0, %v2993_v58  ;;  %v3329_v58 = vld [vmem:[%s6312_s9 + $0xe0] sm:$0xff] }
0x1300   : > { %v4828_v7 = vpack.c.bf16 %v3330_v59, %v3329_v58 }
0x13d2   : > { %v3192_v12 = vpop.f32.mrb[28].mxu1 }
0x13d3   : > { %v3793_v13 = vmul.f32 -1.442695, %v3192_v12  ;;  %v3194_v27 = vpop.f32.mrb[29].mxu1 }
0x13d5   : > { %4937 = vpow2.f32 %v3793_v13 }
0x13df   : > { %v4938_v15 = vpop.eup %4937 }
0x13e0   : > { %v3200_v52 = vadd.f32 1.0, %v4938_v15 }
0x13e2   : > { %4939 = vrcp.f32 %v3200_v52 }
0x13ec   : > { %v4940_v16 = vpop.eup %4939 }
0x13ed   : > { %v3203_v18 = vmul.f32 %v4940_v16, %v3192_v12 }
0x13ef   : > { %v3204_v3 = vmul.f32 %v3203_v18, %v3194_v27  ;;  %v3802_v27 = vld [vmem:[%s6311_s8] ss:$0 sm:$0xff] }
0x13f1   : > { %4478 = vmatmul.mubr.f32.vlgmr.msra.gmra.mrb[24].mxu0 %v3204_v3 }
0x13f2   : > { %4797 = vmatpush3.bf16.xpose.msk.msra.mxu0 %vm5150_vm1, %v4795_v60 }
0x13f3   : > { %4800 = vmatprep.subr.msk.bf16.mxu0 %vm5150_vm1, %v4798_v20 }
0x13fa   : > { %4803 = vmatpush3.bf16.xpose.msk.msra.mxu0 %vm5150_vm1, %v4801_v14 }
0x13fb   : > { %4806 = vmatprep.subr.msk.bf16.mxu0 %vm5150_vm1, %v4804_v17 }
0x1402   : > { %4809 = vmatpush3.bf16.xpose.msk.msra.mxu0 %vm5150_vm1, %v4807_v24 }
0x1403   : > { %4812 = vmatprep.subr.msk.bf16.mxu0 %vm5150_vm1, %v4810_v30 }
0x140a   : > { %4815 = vmatpush3.bf16.xpose.msk.msra.mxu0 %vm5150_vm1, %v4813_v34 }
0x140b   : > { %4818 = vmatprep.subr.msk.bf16.mxu0 %vm5150_vm1, %v4816_v5 }
0x1412   : > { %4821 = vmatpush3.bf16.xpose.msk.msra.mxu0 %vm5150_vm1, %v4819_v41 }
0x1413   : > { %4824 = vmatprep.subr.msk.bf16.mxu0 %vm5150_vm1, %v4822_v42 }
0x141a   : > { %4827 = vmatpush3.bf16.xpose.msk.msra.mxu0 %vm5150_vm1, %v4825_v49 }
0x141b   : > { %4830 = vmatprep.subr.msk.bf16.mxu0 %vm5150_vm1, %v4828_v7 }
0x14c4   : > { %v3280_v51 = vpop.f32.mrb[24].mxu0 }
0x14c5   : > { %v3284_v54 = vadd.f32 %v3280_v51, %v6051_v25  ;;  %v4479_v55 = vpop.f32.mrb[25].mxu0  ;;  %v3314_v25 = vld [vmem:[%s6312_s9 + $0x68] sm:$0xff] }
0x14c6   : > { %v4831_v62 = vpack.c.bf16 %v3314_v25, %v3313_v61 }
0x14c7   : > { %v3285_v56 = vmul.f32 %v3284_v54, %v3284_v54 }
0x14c8   : > { %4833 = vmatpush3.bf16.xpose.msk.msra.mxu0 %vm5150_vm1, %v4831_v62 }
0x14c9   : > { %v3286_v57 = vsel %vm505_vm0, %v3285_v56, 0.0  ;;  %4836 = vmatprep.subr.msk.bf16.mxu0 %vm5150_vm1, %v4834_v53 }
0x14ca   : > { %3287 = vadd.xlane.f32.xlu1 %v3286_v57 }
0x14d0   : > { %4839 = vmatpush3.bf16.xpose.msk.msra.mxu0 %vm5150_vm1, %v4837_v6 }
0x1557   : > { %v3288_v9 = vpop.xlane.xlu1 %3287 }
0x1558   : > { %v3289_v10 = vmul.f32 0.015625, %v3288_v9 }
0x155a   : > { %v3290_v12 = vadd.f32 1e-06, %v3289_v10 }
0x155c   : > { %4941 = vrsqrt.f32 %v3290_v12 }
0x1566   : > { %v4942_v13 = vpop.eup %4941 }
0x1567   : > { %v3292_v15 = vmul.f32 %v4942_v13, %v3284_v54 }
0x1569   : > { %v3300_v52 = vmul.f32 %v3802_v27, %v3292_v15 }
0x156b   : > { %4112 = vmatprep.mubr.msk.f32.mxu0 %vm505_vm0, %v3300_v52 }
0x156c   : > { %4113 = vmatmul.mubr.msk.f32.vlgmr.msra.gmra.mrb[26].mxu0 %vm505_vm0, %v3300_v52 }
0x163f   : > { %v3498_v2 = vpop.f32.mrb[26].mxu0 }
0x1640   : > { %3503 = vst [vmem:[%s458_s22] sm:$0xff] %v3498_v2  ;;  %v3500_v16 = vpop.f32.mrb[27].mxu0 }
0x1641   : > { %3504 = vst [vmem:[%s458_s22 + $0x8] sm:$0xff] %v3500_v16 }
0x1642   : > { %4956 = shalt.err (!%p4953_p3)
}
0x1643   : > { %s4957_s15 = scalar_lea.hbm %s6263_s0, 256  ;;  %s4961_s26 = scalar_lea.hbm %s6317_s14, 512 }
0x1644   : > { %p4958_p4 = scmp.ne.s32.totalorder %s6263_s0, %s4957_s15  ;;  %p4962_p9 = scmp.lt.u32.totalorder %s6263_s0, %s6317_s14 }
0x1645   : > { %p4963_p10 = scmp.lt.u32.totalorder %s4961_s26, %s4957_s15  ;;  %p4965_p12 = scmp.lt.u32.totalorder %s4957_s15, %s6263_s0 }
0x1646   : > { %p4959_p7 = pnand %p4958_p4, %p5131_p5 }
0x1647   : > { %p4964_p11 = por %p4963_p10, %p4962_p9 }
0x1648   : > { %p4960_p8 = pneg %p4959_p7 }
0x1649   : > { %p4966_p13 = por %p4965_p12, %p4964_p11 }
0x164b   : > { %p4967_p0 = pnand %p4966_p13, %p4960_p8 }
0x164d   : > { %4970 = shalt.err (!%p4967_p0)
}
0x164e   : > { %4840 = dma.vmem_to_hbm [thread:$0]  (%p5131_p5), %s6258_s11, 256, %s6263_s0, %s3506_s20  }
0x164f PF: > { %p4846_p1 = scmp.ge.s32.totalorder %s5005_s16, 2  ;;  %s3532_s25 = sand.u32 1, %s4993_s29  }
0x1650   : > { %s3533_s17 = scalar_lea.sflag [#allocation3], %s3532_s25 }
0x1651   : > { %p4843_p2 = pnand %p4846_p1, %p5135_p6 }
0x1653   : > { %4988 = dma.done.wait (!%p4843_p2), %s3533_s17, 256  }
0x1654   : > { %4990 = vsyncadd (!%p4843_p2), %s3533_s17, 4294967040  ;;  %s6350_s21 = sld [smem:[#allocation5_spill]]  ;;  %s6351_s15 = sld [smem:[#allocation6_spill]] }
0x1655   : > { %p24_p3 = scmp.ge.s32.totalorder %s5118_s19, 4   ;;  %s6352_s29 = smov %s4997_s30 }
0x1656   : > { %s6354_s16 = smov %s5118_s19 }
0x1657   :  { %26 = sbr.rel (!%p24_p3) target bundleno = 7 (0x7), region = 118 }
0x165a   : > { %s6353_s30 = smov %s6350_s21 }
0x165e   :  { %3538 = vsyncpa [#allocation3], 1 }
0x165f   :  { %3540 = vsyncpa [#allocation3 + $0x1], 1 }

</bundles_post_ra>
